<compile_context>
chip_gen: v7x
topology: tpu7x:2x2x1
jax: 0.10.0
libtpu: 0.0.40
codegen_flags: <defaults>
</compile_context>

<pallas_src>
import functools

import numpy as np
import jax
import jax.numpy as jnp
from jax.experimental import pallas as pl
from jax.experimental.pallas import tpu as pltpu

_GATE_PITCH = 128   # lane pitch of one GRU gate block (r | z | n)


def _round_up(x, m):
  return (x + m - 1) // m * m


# --------------------------------------------------------------------------- #
# Fused kernel: conv-as-matmul -> MLP -> hoisted GRU projection -> GRU -> fc
# --------------------------------------------------------------------------- #
def _fused_forward_kernel(
    frames_ref,   # (ts, NB, CHW)  bf16  raw CHW-flattened frames, time-major
    wconv_ref,    # (CHW, P*OC)    bf16  conv unrolled as dense matmul (pos-major cols)
    bc_ref,       # (1, P*OC)      f32   conv bias tiled per position
    w1_ref,       # (P*OC, H1)     bf16  Linear1, columns permuted to pos-major flatten
    b1_ref,       # (1, H1)        f32
    w2_ref,       # (H1, D)        bf16
    b2_ref,       # (1, D)         f32
    wih_ref,      # (D, 3*GP)      bf16  GRU input weights, gates at lanes 0/GP/2GP
    bi_ref,       # (1, 3*GP)      f32   [b_ir+b_hr | b_iz+b_hz | b_in] (pre-summed)
    whh_ref,      # (H, 3*GP)      bf16
    bhn_ref,      # (1, H)         f32   b_hn (stays inside r*(...), PyTorch GRU)
    fcw_ref,      # (H, O)         bf16
    fcb_ref,      # (1, O)         f32
    h0_ref,       # (NB, H)        f32
    logits_ref,   # (NB, O)        f32
    hT_ref,       # (NB, H)        f32
    gi_scr,       # (ts, NB, 3*GP) f32   hoisted GRU input projection
    *, ts, hid, gp):
  f32 = jnp.float32
  bf16 = jnp.bfloat16

  wconv = wconv_ref[...]
  bc = bc_ref[...]
  w1 = w1_ref[...]
  b1 = b1_ref[...]
  w2 = w2_ref[...]
  b2 = b2_ref[...]
  wih = wih_ref[...]
  bi = bi_ref[...]

  # ---- Phase 1: encoder + hoisted GRU input projection for all timesteps. ----
  # ts is small & static -> unrolled; switch to lax.fori_loop(..., unroll=True)
  # if ts grows beyond ~8 to bound vreg live ranges.
  for t in range(ts):
    x_t = frames_ref[t]                                             # (NB, CHW) bf16
    y = jnp.maximum(
        jnp.dot(x_t, wconv, preferred_element_type=f32) + bc, 0.0)  # conv + ReLU
    h1 = jnp.maximum(
        jnp.dot(y.astype(bf16), w1, preferred_element_type=f32) + b1, 0.0)
    enc = jnp.maximum(
        jnp.dot(h1.astype(bf16), w2, preferred_element_type=f32) + b2, 0.0)
    gi_scr[t] = jnp.dot(enc.astype(bf16), wih, preferred_element_type=f32) + bi

  # ---- Phase 2: GRU recurrence (only h @ Whh on the sequential critical path). ----
  whh = whh_ref[...]
  bhn = bhn_ref[...]
  h = h0_ref[...]                                                   # f32 state
  for t in range(ts):
    gi = gi_scr[t]                                                  # (NB, 3*GP) f32
    gh = jnp.dot(h.astype(bf16), whh, preferred_element_type=f32)
    r = jax.nn.sigmoid(gi[:, 0:hid] + gh[:, 0:hid])
    z = jax.nn.sigmoid(gi[:, gp:gp + hid] + gh[:, gp:gp + hid])
    n = jnp.tanh(gi[:, 2 * gp:2 * gp + hid]
                 + r * (gh[:, 2 * gp:2 * gp + hid] + bhn))
    h = (1.0 - z) * n + z * h

  hT_ref[...] = h
  logits_ref[...] = (jnp.dot(h.astype(bf16), fcw_ref[...],
                             preferred_element_type=f32) + fcb_ref[...])


# --------------------------------------------------------------------------- #
# Parameters (PyTorch-shaped, transposed / permuted / packed once into kernel layouts)
# --------------------------------------------------------------------------- #
def init_params(key, config):
  ks = jax.random.split(key, 12)
  C, OC, K = config['in_channels'], config['out_channels'], config['kernel_size']
  S = config['stride']
  Hi, Wi = config['img_h'], config['img_w']
  OH = (Hi - K) // S + 1
  OW = (Wi - K) // S + 1
  P = OH * OW
  F, H1, D = config['flatten_dim'], config['cnn_hidden_dim'], config['cnn_output_dim']
  H, O = config['rnn_hidden_size'], config['output_dim']
  GP = _GATE_PITCH
  assert F == OC * P
  assert H <= GP, "GRU hidden size must fit one 128-lane gate block"
  s = 0.1

  # PyTorch-shaped parameters.
  conv_w = s * jax.random.normal(ks[0], (OC, C, K, K), jnp.float32)
  conv_b = s * jax.random.normal(ks[1], (OC,), jnp.float32)
  w1_t   = s * jax.random.normal(ks[2], (H1, F), jnp.float32)    # nn.Linear(F, H1).weight
  b1     = s * jax.random.normal(ks[3], (H1,), jnp.float32)
  w2_t   = s * jax.random.normal(ks[4], (D, H1), jnp.float32)
  b2     = s * jax.random.normal(ks[5], (D,), jnp.float32)
  wih_t  = s * jax.random.normal(ks[6], (3 * H, D), jnp.float32)  # gate order (r, z, n)
  whh_t  = s * jax.random.normal(ks[7], (3 * H, H), jnp.float32)
  bih    = s * jax.random.normal(ks[8], (3 * H,), jnp.float32)
  bhh    = s * jax.random.normal(ks[9], (3 * H,), jnp.float32)
  fc_w_t = s * jax.random.normal(ks[10], (O, H), jnp.float32)
  fc_b   = s * jax.random.normal(ks[11], (O,), jnp.float32)

  # Conv2d unrolled as a dense matmul over CHW-flattened frame rows.
  # Column (p = i*OW + j, oc) holds conv_w[oc, c, kh, kw] at input row
  # c*Hi*Wi + (i*S+kh)*Wi + (j*S+kw); everything else is zero.
  cw = np.asarray(conv_w)
  wd = np.zeros((C * Hi * Wi, P * OC), np.float32)
  for i in range(OH):
    for j in range(OW):
      p = i * OW + j
      for kh in range(K):
        for kw in range(K):
          rows = np.arange(C) * Hi * Wi + (i * S + kh) * Wi + (j * S + kw)
          wd[rows, p * OC:(p + 1) * OC] = cw[:, :, kh, kw].T
  bc_tiled = np.tile(np.asarray(conv_b), P).reshape(1, P * OC)

  # Linear1 columns permuted from PyTorch's (oc, oh, ow) flatten order to the kernel's
  # position-major (oh, ow, oc) order -> no activation transpose anywhere at runtime.
  w1 = (np.asarray(w1_t).reshape(H1, OC, OH, OW)
        .transpose(0, 2, 3, 1).reshape(H1, P * OC).T)

  # GRU weights packed with a 128-lane gate pitch (r | z | n at lanes 0/GP/2GP);
  # r/z biases pre-summed, b_hn kept separate (it lives inside r*(...)).
  wih_np, whh_np = np.asarray(wih_t), np.asarray(whh_t)
  bih_np, bhh_np = np.asarray(bih), np.asarray(bhh)
  wih_pack = np.zeros((D, 3 * GP), np.float32)
  whh_pack = np.zeros((H, 3 * GP), np.float32)
  b_i = np.zeros((1, 3 * GP), np.float32)
  for g in range(3):
    wih_pack[:, g * GP:g * GP + H] = wih_np[g * H:(g + 1) * H, :].T
    whh_pack[:, g * GP:g * GP + H] = whh_np[g * H:(g + 1) * H, :].T
  b_i[0, 0:H] = bih_np[0:H] + bhh_np[0:H]
  b_i[0, GP:GP + H] = bih_np[H:2 * H] + bhh_np[H:2 * H]
  b_i[0, 2 * GP:2 * GP + H] = bih_np[2 * H:3 * H]
  b_hn = bhh_np[2 * H:3 * H].reshape(1, H)

  bf16, f32 = jnp.bfloat16, jnp.float32
  return dict(
      conv_w=jnp.asarray(wd, bf16), conv_b=jnp.asarray(bc_tiled, f32),
      w1=jnp.asarray(w1, bf16), b1=jnp.asarray(b1).reshape(1, H1).astype(f32),
      w2=jnp.asarray(w2_t).T.astype(bf16), b2=jnp.asarray(b2).reshape(1, D).astype(f32),
      gru_wih=jnp.asarray(wih_pack, bf16), gru_b_i=jnp.asarray(b_i, f32),
      gru_whh=jnp.asarray(whh_pack, bf16), gru_b_hn=jnp.asarray(b_hn, f32),
      fc_w=jnp.asarray(fc_w_t).T.astype(bf16),
      fc_b=jnp.asarray(fc_b).reshape(1, O).astype(f32),
  )


# --------------------------------------------------------------------------- #
# Forward
# --------------------------------------------------------------------------- #
def conv_gru_mappo_forward(obs, params, config, state=None, block_nb=None):
  """obs: (bs, ts, C, H, W) float32. Returns (logits (bs, O), state (L, bs, H))."""
  bs, ts, c, h_img, w_img = obs.shape
  H = config['rnn_hidden_size']
  O = config['output_dim']
  num_layers = config['rnn_num_layers']
  assert num_layers == 1, "Pallas kernel implements rnn_num_layers == 1 only"
  GP = _GATE_PITCH
  chw = c * h_img * w_img
  stride, k, oc = config['stride'], config['kernel_size'], config['out_channels']
  oh = (h_img - k) // stride + 1
  ow = (w_img - k) // stride + 1
  pc = oh * ow * oc
  h1d, d = config['cnn_hidden_dim'], config['cnn_output_dim']

  # Batch tiling: block_nb rows per grid step (multiple of 8 sublanes).
  # TODO(synk): at production batch sizes, tune block_nb against v7x's 64 MiB VMEM.
  if block_nb is None:
    block_nb = min(256, _round_up(bs, 8))
  block_nb = _round_up(block_nb, 8)
  bs_pad = _round_up(bs, block_nb)
  nblocks = bs_pad // block_nb

  # Host-side glue: time-major frames with CHW-flattened rows (a cheap reshape of the
  # RAW obs -- no im2col, no pixel replication), padded to the block grid, cast bf16.
  frames = jnp.transpose(obs, (1, 0, 2, 3, 4)).reshape(ts, bs, chw)
  if bs_pad != bs:
    frames = jnp.pad(frames, ((0, 0), (0, bs_pad - bs), (0, 0)))
  frames = frames.astype(jnp.bfloat16)

  if state is None:
    h0 = jnp.zeros((bs_pad, H), jnp.float32)
  else:
    h0 = state.reshape(bs, H).astype(jnp.float32)
    if bs_pad != bs:
      h0 = jnp.pad(h0, ((0, bs_pad - bs), (0, 0)))

  const = lambda i: (0, 0)
  batch = lambda i: (i, 0)
  in_specs = [
      pl.BlockSpec((ts, block_nb, chw), lambda i: (0, i, 0)),      # frames (pipelined)
      pl.BlockSpec((chw, pc), const),                              # conv_w (dense unroll)
      pl.BlockSpec((1, pc), const),                                # conv_b (tiled)
      pl.BlockSpec((pc, h1d), const),                              # w1 (pos-major cols)
      pl.BlockSpec((1, h1d), const),                               # b1
      pl.BlockSpec((h1d, d), const),                               # w2
      pl.BlockSpec((1, d), const),                                 # b2
      pl.BlockSpec((d, 3 * GP), const),                            # gru wih (padded gates)
      pl.BlockSpec((1, 3 * GP), const),                            # gru b_i
      pl.BlockSpec((H, 3 * GP), const),                            # gru whh
      pl.BlockSpec((1, H), const),                                 # gru b_hn
      pl.BlockSpec((H, O), const),                                 # fc_w
      pl.BlockSpec((1, O), const),                                 # fc_b
      pl.BlockSpec((block_nb, H), batch),                          # h0
  ]
  out_specs = (pl.BlockSpec((block_nb, O), batch),
               pl.BlockSpec((block_nb, H), batch))

  # Advisory cost estimate for XLA scheduling around the custom call.
  enc_macs = chw * pc + pc * h1d + h1d * d + d * 3 * GP
  flops = 2 * (bs_pad * ts * (enc_macs + H * 3 * GP) + bs_pad * H * O)
  weight_bytes = sum(int(v.size) * v.dtype.itemsize for v in params.values())
  bytes_accessed = (int(frames.size) * frames.dtype.itemsize + weight_bytes
                    + bs_pad * (H + H + O) * 4)
  cost = pl.CostEstimate(flops=int(flops),
                         transcendentals=int(bs_pad * ts * 3 * H),
                         bytes_accessed=int(bytes_accessed))

  kern = functools.partial(_fused_forward_kernel, ts=ts, hid=H, gp=GP)
  logits, h_final = pl.pallas_call(
      kern,
      out_shape=(jax.ShapeDtypeStruct((bs_pad, O), jnp.float32),
                 jax.ShapeDtypeStruct((bs_pad, H), jnp.float32)),
      grid_spec=pltpu.PrefetchScalarGridSpec(
          num_scalar_prefetch=0,
          grid=(nblocks,),
          in_specs=in_specs,
          out_specs=out_specs,
          scratch_shapes=[pltpu.VMEM((ts, block_nb, 3 * GP), jnp.float32)]),
      compiler_params=pltpu.CompilerParams(
          dimension_semantics=("parallel",),     # 2x on v7x's 2 TCs; no-op v5e/v6e
          vmem_limit_bytes=32 * 1024 * 1024),    # raise v5e's 16 MiB scoped default
      cost_estimate=cost,
  )(frames,
    params['conv_w'], params['conv_b'],
    params['w1'], params['b1'], params['w2'], params['b2'],
    params['gru_wih'], params['gru_b_i'], params['gru_whh'], params['gru_b_hn'],
    params['fc_w'], params['fc_b'], h0)

  logits_out = logits[:bs]
  state_out = h_final[:bs].reshape(num_layers, bs, H)
  return logits_out, state_out


# --------------------------------------------------------------------------- #
if __name__ == "__main__":
  bs, ts = 16, 4
  c, h, w = 4, 8, 8
  k, stride, oc = 3, 1, 8
  oh = (h - k) // stride + 1
  ow = (w - k) // stride + 1

  config = dict(
      in_channels=c, out_channels=oc, kernel_size=k, stride=stride,
      img_h=h, img_w=w,
      flatten_dim=oc * oh * ow, cnn_hidden_dim=32, cnn_output_dim=16,
      rnn_input_size=16, rnn_hidden_size=32, rnn_num_layers=1,
      rnn_batch_first=True, output_dim=8,
  )

  key = jax.random.PRNGKey(0)
  k_obs, k_par = jax.random.split(key)
  obs = jax.random.normal(k_obs, (bs, ts, c, h, w), jnp.float32)
  params = init_params(k_par, config)

  # block_nb=8 -> a 2-step grid even at this toy batch (exercises the pipeline).
  logits, state = conv_gru_mappo_forward(obs, params, config, state=None, block_nb=8)
  logits, state = jax.block_until_ready((logits, state))

  assert logits.shape == (bs, config['output_dim']), logits.shape
  assert state.shape == (config['rnn_num_layers'], bs,
                         config['rnn_hidden_size']), state.shape
  assert bool(jnp.all(jnp.isfinite(logits))) and bool(jnp.all(jnp.isfinite(state)))
  print("KERNEL_OK")
</pallas_src>

<mosaic_0001>
module attributes {stable_mosaic.version = 11 : i64} {
  func.func @_fused_forward_kernel(%arg0: i32, %arg1: memref<4x8x256xbf16, #tpu.memory_space<vmem>>, %arg2: memref<256x288xbf16, #tpu.memory_space<vmem>>, %arg3: memref<1x288xf32, #tpu.memory_space<vmem>>, %arg4: memref<288x32xbf16, #tpu.memory_space<vmem>>, %arg5: memref<1x32xf32, #tpu.memory_space<vmem>>, %arg6: memref<32x16xbf16, #tpu.memory_space<vmem>>, %arg7: memref<1x16xf32, #tpu.memory_space<vmem>>, %arg8: memref<16x384xbf16, #tpu.memory_space<vmem>>, %arg9: memref<1x384xf32, #tpu.memory_space<vmem>>, %arg10: memref<32x384xbf16, #tpu.memory_space<vmem>>, %arg11: memref<1x32xf32, #tpu.memory_space<vmem>>, %arg12: memref<32x8xbf16, #tpu.memory_space<vmem>>, %arg13: memref<1x8xf32, #tpu.memory_space<vmem>>, %arg14: memref<8x32xf32, #tpu.memory_space<vmem>>, %arg15: memref<8x8xf32, #tpu.memory_space<vmem>>, %arg16: memref<8x32xf32, #tpu.memory_space<vmem>>, %arg17: memref<4x8x384xf32, #tpu.memory_space<vmem>>) attributes {dimension_semantics = [#tpu.dimension_semantics<parallel>], iteration_bounds = array<i64: 2>, scalar_prefetch = 0 : i64, scratch_operands = 1 : i64, tpu.core_type = #tpu.core_type<tc>, window_params = [{transform_indices = @transform_0, window_bounds = array<i64: 4, 8, 256>}, {pipeline_mode = #tpu.pipeline_mode<synchronous>, transform_indices = @transform_1, window_bounds = array<i64: 256, 288>}, {pipeline_mode = #tpu.pipeline_mode<synchronous>, transform_indices = @transform_2, window_bounds = array<i64: 1, 288>}, {pipeline_mode = #tpu.pipeline_mode<synchronous>, transform_indices = @transform_3, window_bounds = array<i64: 288, 32>}, {pipeline_mode = #tpu.pipeline_mode<synchronous>, transform_indices = @transform_4, window_bounds = array<i64: 1, 32>}, {pipeline_mode = #tpu.pipeline_mode<synchronous>, transform_indices = @transform_5, window_bounds = array<i64: 32, 16>}, {pipeline_mode = #tpu.pipeline_mode<synchronous>, transform_indices = @transform_6, window_bounds = array<i64: 1, 16>}, {pipeline_mode = #tpu.pipeline_mode<synchronous>, transform_indices = @transform_7, window_bounds = array<i64: 16, 384>}, {pipeline_mode = #tpu.pipeline_mode<synchronous>, transform_indices = @transform_8, window_bounds = array<i64: 1, 384>}, {pipeline_mode = #tpu.pipeline_mode<synchronous>, transform_indices = @transform_9, window_bounds = array<i64: 32, 384>}, {pipeline_mode = #tpu.pipeline_mode<synchronous>, transform_indices = @transform_10, window_bounds = array<i64: 1, 32>}, {pipeline_mode = #tpu.pipeline_mode<synchronous>, transform_indices = @transform_11, window_bounds = array<i64: 32, 8>}, {pipeline_mode = #tpu.pipeline_mode<synchronous>, transform_indices = @transform_12, window_bounds = array<i64: 1, 8>}, {transform_indices = @transform_13, window_bounds = array<i64: 8, 32>}, {transform_indices = @transform_14, window_bounds = array<i64: 8, 8>}, {transform_indices = @transform_15, window_bounds = array<i64: 8, 32>}]} {
    %c0 = arith.constant 0 : index
    %c0_0 = arith.constant 0 : index
    %0 = vector.load %arg2[%c0, %c0_0] : memref<256x288xbf16, #tpu.memory_space<vmem>>, vector<256x288xbf16>
    %c0_1 = arith.constant 0 : index
    %c0_2 = arith.constant 0 : index
    %1 = vector.load %arg3[%c0_1, %c0_2] : memref<1x288xf32, #tpu.memory_space<vmem>>, vector<1x288xf32>
    %c0_3 = arith.constant 0 : index
    %c0_4 = arith.constant 0 : index
    %2 = vector.load %arg4[%c0_3, %c0_4] : memref<288x32xbf16, #tpu.memory_space<vmem>>, vector<288x32xbf16>
    %c0_5 = arith.constant 0 : index
    %c0_6 = arith.constant 0 : index
    %3 = vector.load %arg5[%c0_5, %c0_6] : memref<1x32xf32, #tpu.memory_space<vmem>>, vector<1x32xf32>
    %c0_7 = arith.constant 0 : index
    %c0_8 = arith.constant 0 : index
    %4 = vector.load %arg6[%c0_7, %c0_8] : memref<32x16xbf16, #tpu.memory_space<vmem>>, vector<32x16xbf16>
    %c0_9 = arith.constant 0 : index
    %c0_10 = arith.constant 0 : index
    %5 = vector.load %arg7[%c0_9, %c0_10] : memref<1x16xf32, #tpu.memory_space<vmem>>, vector<1x16xf32>
    %c0_11 = arith.constant 0 : index
    %c0_12 = arith.constant 0 : index
    %6 = vector.load %arg8[%c0_11, %c0_12] : memref<16x384xbf16, #tpu.memory_space<vmem>>, vector<16x384xbf16>
    %c0_13 = arith.constant 0 : index
    %c0_14 = arith.constant 0 : index
    %7 = vector.load %arg9[%c0_13, %c0_14] : memref<1x384xf32, #tpu.memory_space<vmem>>, vector<1x384xf32>
    %c0_15 = arith.constant 0 : index
    %c0_16 = arith.constant 0 : index
    %c0_17 = arith.constant 0 : index
    %8 = vector.load %arg1[%c0_15, %c0_16, %c0_17] : memref<4x8x256xbf16, #tpu.memory_space<vmem>>, vector<1x8x256xbf16>
    %9 = vector.shape_cast %8 : vector<1x8x256xbf16> to vector<8x256xbf16>
    %cst = arith.constant dense<0.000000e+00> : vector<8x288xf32>
    %10 = tpu.matmul %9, %0, %cst {dimension_numbers = #tpu.dot_dimension_numbers<[1], [0], [0], [1], [0, 0, 1, 1], [], []>} : vector<8x256xbf16>, vector<256x288xbf16>, vector<8x288xf32> -> vector<8x288xf32>
    %11 = vector.broadcast %1 : vector<1x288xf32> to vector<8x288xf32>
    %12 = arith.addf %10, %11 : vector<8x288xf32>
    %cst_18 = arith.constant 0.000000e+00 : f32
    %13 = vector.broadcast %cst_18 : f32 to vector<8x288xf32>
    %14 = arith.maximumf %12, %13 : vector<8x288xf32>
    %15 = arith.truncf %14 : vector<8x288xf32> to vector<8x288xbf16>
    %cst_19 = arith.constant dense<0.000000e+00> : vector<8x32xf32>
    %16 = tpu.matmul %15, %2, %cst_19 {dimension_numbers = #tpu.dot_dimension_numbers<[1], [0], [0], [1], [0, 0, 1, 1], [], []>} : vector<8x288xbf16>, vector<288x32xbf16>, vector<8x32xf32> -> vector<8x32xf32>
    %17 = vector.broadcast %3 : vector<1x32xf32> to vector<8x32xf32>
    %18 = arith.addf %16, %17 : vector<8x32xf32>
    %cst_20 = arith.constant 0.000000e+00 : f32
    %19 = vector.broadcast %cst_20 : f32 to vector<8x32xf32>
    %20 = arith.maximumf %18, %19 : vector<8x32xf32>
    %21 = arith.truncf %20 : vector<8x32xf32> to vector<8x32xbf16>
    %cst_21 = arith.constant dense<0.000000e+00> : vector<8x16xf32>
    %22 = tpu.matmul %21, %4, %cst_21 {dimension_numbers = #tpu.dot_dimension_numbers<[1], [0], [0], [1], [0, 0, 1, 1], [], []>} : vector<8x32xbf16>, vector<32x16xbf16>, vector<8x16xf32> -> vector<8x16xf32>
    %23 = vector.broadcast %5 : vector<1x16xf32> to vector<8x16xf32>
    %24 = arith.addf %22, %23 : vector<8x16xf32>
    %cst_22 = arith.constant 0.000000e+00 : f32
    %25 = vector.broadcast %cst_22 : f32 to vector<8x16xf32>
    %26 = arith.maximumf %24, %25 : vector<8x16xf32>
    %27 = arith.truncf %26 : vector<8x16xf32> to vector<8x16xbf16>
    %cst_23 = arith.constant dense<0.000000e+00> : vector<8x384xf32>
    %28 = tpu.matmul %27, %6, %cst_23 {dimension_numbers = #tpu.dot_dimension_numbers<[1], [0], [0], [1], [0, 0, 1, 1], [], []>} : vector<8x16xbf16>, vector<16x384xbf16>, vector<8x384xf32> -> vector<8x384xf32>
    %29 = vector.broadcast %7 : vector<1x384xf32> to vector<8x384xf32>
    %30 = arith.addf %28, %29 : vector<8x384xf32>
    %c0_24 = arith.constant 0 : index
    %c0_25 = arith.constant 0 : index
    %c0_26 = arith.constant 0 : index
    %31 = vector.load %arg17[%c0_24, %c0_25, %c0_26] : memref<4x8x384xf32, #tpu.memory_space<vmem>>, vector<1x8x384xf32>
    %32 = vector.shape_cast %31 : vector<1x8x384xf32> to vector<8x384xf32>
    %33 = vector.shape_cast %30 : vector<8x384xf32> to vector<1x8x384xf32>
    tpu.vector_store %arg17[%c0_24, %c0_25, %c0_26], %33 {strides = array<i32>} : memref<4x8x384xf32, #tpu.memory_space<vmem>>, vector<1x8x384xf32>,
    %c1 = arith.constant 1 : index
    %c0_27 = arith.constant 0 : index
    %c0_28 = arith.constant 0 : index
    %34 = vector.load %arg1[%c1, %c0_27, %c0_28] : memref<4x8x256xbf16, #tpu.memory_space<vmem>>, vector<1x8x256xbf16>
    %35 = vector.shape_cast %34 : vector<1x8x256xbf16> to vector<8x256xbf16>
    %cst_29 = arith.constant dense<0.000000e+00> : vector<8x288xf32>
    %36 = tpu.matmul %35, %0, %cst_29 {dimension_numbers = #tpu.dot_dimension_numbers<[1], [0], [0], [1], [0, 0, 1, 1], [], []>} : vector<8x256xbf16>, vector<256x288xbf16>, vector<8x288xf32> -> vector<8x288xf32>
    %37 = vector.broadcast %1 : vector<1x288xf32> to vector<8x288xf32>
    %38 = arith.addf %36, %37 : vector<8x288xf32>
    %cst_30 = arith.constant 0.000000e+00 : f32
    %39 = vector.broadcast %cst_30 : f32 to vector<8x288xf32>
    %40 = arith.maximumf %38, %39 : vector<8x288xf32>
    %41 = arith.truncf %40 : vector<8x288xf32> to vector<8x288xbf16>
    %cst_31 = arith.constant dense<0.000000e+00> : vector<8x32xf32>
    %42 = tpu.matmul %41, %2, %cst_31 {dimension_numbers = #tpu.dot_dimension_numbers<[1], [0], [0], [1], [0, 0, 1, 1], [], []>} : vector<8x288xbf16>, vector<288x32xbf16>, vector<8x32xf32> -> vector<8x32xf32>
    %43 = vector.broadcast %3 : vector<1x32xf32> to vector<8x32xf32>
    %44 = arith.addf %42, %43 : vector<8x32xf32>
    %cst_32 = arith.constant 0.000000e+00 : f32
    %45 = vector.broadcast %cst_32 : f32 to vector<8x32xf32>
    %46 = arith.maximumf %44, %45 : vector<8x32xf32>
    %47 = arith.truncf %46 : vector<8x32xf32> to vector<8x32xbf16>
    %cst_33 = arith.constant dense<0.000000e+00> : vector<8x16xf32>
    %48 = tpu.matmul %47, %4, %cst_33 {dimension_numbers = #tpu.dot_dimension_numbers<[1], [0], [0], [1], [0, 0, 1, 1], [], []>} : vector<8x32xbf16>, vector<32x16xbf16>, vector<8x16xf32> -> vector<8x16xf32>
    %49 = vector.broadcast %5 : vector<1x16xf32> to vector<8x16xf32>
    %50 = arith.addf %48, %49 : vector<8x16xf32>
    %cst_34 = arith.constant 0.000000e+00 : f32
    %51 = vector.broadcast %cst_34 : f32 to vector<8x16xf32>
    %52 = arith.maximumf %50, %51 : vector<8x16xf32>
    %53 = arith.truncf %52 : vector<8x16xf32> to vector<8x16xbf16>
    %cst_35 = arith.constant dense<0.000000e+00> : vector<8x384xf32>
    %54 = tpu.matmul %53, %6, %cst_35 {dimension_numbers = #tpu.dot_dimension_numbers<[1], [0], [0], [1], [0, 0, 1, 1], [], []>} : vector<8x16xbf16>, vector<16x384xbf16>, vector<8x384xf32> -> vector<8x384xf32>
    %55 = vector.broadcast %7 : vector<1x384xf32> to vector<8x384xf32>
    %56 = arith.addf %54, %55 : vector<8x384xf32>
    %c1_36 = arith.constant 1 : index
    %c0_37 = arith.constant 0 : index
    %c0_38 = arith.constant 0 : index
    %57 = vector.load %arg17[%c1_36, %c0_37, %c0_38] : memref<4x8x384xf32, #tpu.memory_space<vmem>>, vector<1x8x384xf32>
    %58 = vector.shape_cast %57 : vector<1x8x384xf32> to vector<8x384xf32>
    %59 = vector.shape_cast %56 : vector<8x384xf32> to vector<1x8x384xf32>
    tpu.vector_store %arg17[%c1_36, %c0_37, %c0_38], %59 {strides = array<i32>} : memref<4x8x384xf32, #tpu.memory_space<vmem>>, vector<1x8x384xf32>,
    %c2 = arith.constant 2 : index
    %c0_39 = arith.constant 0 : index
    %c0_40 = arith.constant 0 : index
    %60 = vector.load %arg1[%c2, %c0_39, %c0_40] : memref<4x8x256xbf16, #tpu.memory_space<vmem>>, vector<1x8x256xbf16>
    %61 = vector.shape_cast %60 : vector<1x8x256xbf16> to vector<8x256xbf16>
    %cst_41 = arith.constant dense<0.000000e+00> : vector<8x288xf32>
    %62 = tpu.matmul %61, %0, %cst_41 {dimension_numbers = #tpu.dot_dimension_numbers<[1], [0], [0], [1], [0, 0, 1, 1], [], []>} : vector<8x256xbf16>, vector<256x288xbf16>, vector<8x288xf32> -> vector<8x288xf32>
    %63 = vector.broadcast %1 : vector<1x288xf32> to vector<8x288xf32>
    %64 = arith.addf %62, %63 : vector<8x288xf32>
    %cst_42 = arith.constant 0.000000e+00 : f32
    %65 = vector.broadcast %cst_42 : f32 to vector<8x288xf32>
    %66 = arith.maximumf %64, %65 : vector<8x288xf32>
    %67 = arith.truncf %66 : vector<8x288xf32> to vector<8x288xbf16>
    %cst_43 = arith.constant dense<0.000000e+00> : vector<8x32xf32>
    %68 = tpu.matmul %67, %2, %cst_43 {dimension_numbers = #tpu.dot_dimension_numbers<[1], [0], [0], [1], [0, 0, 1, 1], [], []>} : vector<8x288xbf16>, vector<288x32xbf16>, vector<8x32xf32> -> vector<8x32xf32>
    %69 = vector.broadcast %3 : vector<1x32xf32> to vector<8x32xf32>
    %70 = arith.addf %68, %69 : vector<8x32xf32>
    %cst_44 = arith.constant 0.000000e+00 : f32
    %71 = vector.broadcast %cst_44 : f32 to vector<8x32xf32>
    %72 = arith.maximumf %70, %71 : vector<8x32xf32>
    %73 = arith.truncf %72 : vector<8x32xf32> to vector<8x32xbf16>
    %cst_45 = arith.constant dense<0.000000e+00> : vector<8x16xf32>
    %74 = tpu.matmul %73, %4, %cst_45 {dimension_numbers = #tpu.dot_dimension_numbers<[1], [0], [0], [1], [0, 0, 1, 1], [], []>} : vector<8x32xbf16>, vector<32x16xbf16>, vector<8x16xf32> -> vector<8x16xf32>
    %75 = vector.broadcast %5 : vector<1x16xf32> to vector<8x16xf32>
    %76 = arith.addf %74, %75 : vector<8x16xf32>
    %cst_46 = arith.constant 0.000000e+00 : f32
    %77 = vector.broadcast %cst_46 : f32 to vector<8x16xf32>
    %78 = arith.maximumf %76, %77 : vector<8x16xf32>
    %79 = arith.truncf %78 : vector<8x16xf32> to vector<8x16xbf16>
    %cst_47 = arith.constant dense<0.000000e+00> : vector<8x384xf32>
    %80 = tpu.matmul %79, %6, %cst_47 {dimension_numbers = #tpu.dot_dimension_numbers<[1], [0], [0], [1], [0, 0, 1, 1], [], []>} : vector<8x16xbf16>, vector<16x384xbf16>, vector<8x384xf32> -> vector<8x384xf32>
    %81 = vector.broadcast %7 : vector<1x384xf32> to vector<8x384xf32>
    %82 = arith.addf %80, %81 : vector<8x384xf32>
    %c2_48 = arith.constant 2 : index
    %c0_49 = arith.constant 0 : index
    %c0_50 = arith.constant 0 : index
    %83 = vector.load %arg17[%c2_48, %c0_49, %c0_50] : memref<4x8x384xf32, #tpu.memory_space<vmem>>, vector<1x8x384xf32>
    %84 = vector.shape_cast %83 : vector<1x8x384xf32> to vector<8x384xf32>
    %85 = vector.shape_cast %82 : vector<8x384xf32> to vector<1x8x384xf32>
    tpu.vector_store %arg17[%c2_48, %c0_49, %c0_50], %85 {strides = array<i32>} : memref<4x8x384xf32, #tpu.memory_space<vmem>>, vector<1x8x384xf32>,
    %c3 = arith.constant 3 : index
    %c0_51 = arith.constant 0 : index
    %c0_52 = arith.constant 0 : index
    %86 = vector.load %arg1[%c3, %c0_51, %c0_52] : memref<4x8x256xbf16, #tpu.memory_space<vmem>>, vector<1x8x256xbf16>
    %87 = vector.shape_cast %86 : vector<1x8x256xbf16> to vector<8x256xbf16>
    %cst_53 = arith.constant dense<0.000000e+00> : vector<8x288xf32>
    %88 = tpu.matmul %87, %0, %cst_53 {dimension_numbers = #tpu.dot_dimension_numbers<[1], [0], [0], [1], [0, 0, 1, 1], [], []>} : vector<8x256xbf16>, vector<256x288xbf16>, vector<8x288xf32> -> vector<8x288xf32>
    %89 = vector.broadcast %1 : vector<1x288xf32> to vector<8x288xf32>
    %90 = arith.addf %88, %89 : vector<8x288xf32>
    %cst_54 = arith.constant 0.000000e+00 : f32
    %91 = vector.broadcast %cst_54 : f32 to vector<8x288xf32>
    %92 = arith.maximumf %90, %91 : vector<8x288xf32>
    %93 = arith.truncf %92 : vector<8x288xf32> to vector<8x288xbf16>
    %cst_55 = arith.constant dense<0.000000e+00> : vector<8x32xf32>
    %94 = tpu.matmul %93, %2, %cst_55 {dimension_numbers = #tpu.dot_dimension_numbers<[1], [0], [0], [1], [0, 0, 1, 1], [], []>} : vector<8x288xbf16>, vector<288x32xbf16>, vector<8x32xf32> -> vector<8x32xf32>
    %95 = vector.broadcast %3 : vector<1x32xf32> to vector<8x32xf32>
    %96 = arith.addf %94, %95 : vector<8x32xf32>
    %cst_56 = arith.constant 0.000000e+00 : f32
    %97 = vector.broadcast %cst_56 : f32 to vector<8x32xf32>
    %98 = arith.maximumf %96, %97 : vector<8x32xf32>
    %99 = arith.truncf %98 : vector<8x32xf32> to vector<8x32xbf16>
    %cst_57 = arith.constant dense<0.000000e+00> : vector<8x16xf32>
    %100 = tpu.matmul %99, %4, %cst_57 {dimension_numbers = #tpu.dot_dimension_numbers<[1], [0], [0], [1], [0, 0, 1, 1], [], []>} : vector<8x32xbf16>, vector<32x16xbf16>, vector<8x16xf32> -> vector<8x16xf32>
    %101 = vector.broadcast %5 : vector<1x16xf32> to vector<8x16xf32>
    %102 = arith.addf %100, %101 : vector<8x16xf32>
    %cst_58 = arith.constant 0.000000e+00 : f32
    %103 = vector.broadcast %cst_58 : f32 to vector<8x16xf32>
    %104 = arith.maximumf %102, %103 : vector<8x16xf32>
    %105 = arith.truncf %104 : vector<8x16xf32> to vector<8x16xbf16>
    %cst_59 = arith.constant dense<0.000000e+00> : vector<8x384xf32>
    %106 = tpu.matmul %105, %6, %cst_59 {dimension_numbers = #tpu.dot_dimension_numbers<[1], [0], [0], [1], [0, 0, 1, 1], [], []>} : vector<8x16xbf16>, vector<16x384xbf16>, vector<8x384xf32> -> vector<8x384xf32>
    %107 = vector.broadcast %7 : vector<1x384xf32> to vector<8x384xf32>
    %108 = arith.addf %106, %107 : vector<8x384xf32>
    %c3_60 = arith.constant 3 : index
    %c0_61 = arith.constant 0 : index
    %c0_62 = arith.constant 0 : index
    %109 = vector.load %arg17[%c3_60, %c0_61, %c0_62] : memref<4x8x384xf32, #tpu.memory_space<vmem>>, vector<1x8x384xf32>
    %110 = vector.shape_cast %109 : vector<1x8x384xf32> to vector<8x384xf32>
    %111 = vector.shape_cast %108 : vector<8x384xf32> to vector<1x8x384xf32>
    tpu.vector_store %arg17[%c3_60, %c0_61, %c0_62], %111 {strides = array<i32>} : memref<4x8x384xf32, #tpu.memory_space<vmem>>, vector<1x8x384xf32>,
    %c0_63 = arith.constant 0 : index
    %c0_64 = arith.constant 0 : index
    %112 = vector.load %arg10[%c0_63, %c0_64] : memref<32x384xbf16, #tpu.memory_space<vmem>>, vector<32x384xbf16>
    %c0_65 = arith.constant 0 : index
    %c0_66 = arith.constant 0 : index
    %113 = vector.load %arg11[%c0_65, %c0_66] : memref<1x32xf32, #tpu.memory_space<vmem>>, vector<1x32xf32>
    %c0_67 = arith.constant 0 : index
    %c0_68 = arith.constant 0 : index
    %114 = vector.load %arg14[%c0_67, %c0_68] : memref<8x32xf32, #tpu.memory_space<vmem>>, vector<8x32xf32>
    %c0_69 = arith.constant 0 : index
    %c0_70 = arith.constant 0 : index
    %c0_71 = arith.constant 0 : index
    %115 = vector.load %arg17[%c0_69, %c0_70, %c0_71] : memref<4x8x384xf32, #tpu.memory_space<vmem>>, vector<1x8x384xf32>
    %116 = vector.shape_cast %115 : vector<1x8x384xf32> to vector<8x384xf32>
    %117 = arith.truncf %114 : vector<8x32xf32> to vector<8x32xbf16>
    %cst_72 = arith.constant dense<0.000000e+00> : vector<8x384xf32>
    %118 = tpu.matmul %117, %112, %cst_72 {dimension_numbers = #tpu.dot_dimension_numbers<[1], [0], [0], [1], [0, 0, 1, 1], [], []>} : vector<8x32xbf16>, vector<32x384xbf16>, vector<8x384xf32> -> vector<8x384xf32>
    %119 = vector.extract_strided_slice %116 {offsets = [0, 0], sizes = [8, 32], strides = [1, 1]} : vector<8x384xf32> to vector<8x32xf32>
    %120 = vector.extract_strided_slice %118 {offsets = [0, 0], sizes = [8, 32], strides = [1, 1]} : vector<8x384xf32> to vector<8x32xf32>
    %121 = arith.addf %119, %120 : vector<8x32xf32>
    %122 = arith.negf %121 : vector<8x32xf32>
    %123 = math.exp %122 : vector<8x32xf32>
    %cst_73 = arith.constant 1.000000e+00 : f32
    %124 = vector.broadcast %cst_73 : f32 to vector<8x32xf32>
    %125 = arith.addf %124, %123 : vector<8x32xf32>
    %126 = arith.divf %124, %125 : vector<8x32xf32>
    %127 = vector.extract_strided_slice %116 {offsets = [0, 128], sizes = [8, 32], strides = [1, 1]} : vector<8x384xf32> to vector<8x32xf32>
    %128 = vector.extract_strided_slice %118 {offsets = [0, 128], sizes = [8, 32], strides = [1, 1]} : vector<8x384xf32> to vector<8x32xf32>
    %129 = arith.addf %127, %128 : vector<8x32xf32>
    %130 = arith.negf %129 : vector<8x32xf32>
    %131 = math.exp %130 : vector<8x32xf32>
    %cst_74 = arith.constant 1.000000e+00 : f32
    %132 = vector.broadcast %cst_74 : f32 to vector<8x32xf32>
    %133 = arith.addf %132, %131 : vector<8x32xf32>
    %134 = arith.divf %132, %133 : vector<8x32xf32>
    %135 = vector.extract_strided_slice %116 {offsets = [0, 256], sizes = [8, 32], strides = [1, 1]} : vector<8x384xf32> to vector<8x32xf32>
    %136 = vector.extract_strided_slice %118 {offsets = [0, 256], sizes = [8, 32], strides = [1, 1]} : vector<8x384xf32> to vector<8x32xf32>
    %137 = vector.broadcast %113 : vector<1x32xf32> to vector<8x32xf32>
    %138 = arith.addf %136, %137 : vector<8x32xf32>
    %139 = arith.mulf %126, %138 : vector<8x32xf32>
    %140 = arith.addf %135, %139 : vector<8x32xf32>
    %141 = math.tanh %140 : vector<8x32xf32>
    %cst_75 = arith.constant 1.000000e+00 : f32
    %142 = vector.broadcast %cst_75 : f32 to vector<8x32xf32>
    %143 = arith.subf %142, %134 : vector<8x32xf32>
    %144 = arith.mulf %143, %141 : vector<8x32xf32>
    %145 = arith.mulf %134, %114 : vector<8x32xf32>
    %146 = arith.addf %144, %145 : vector<8x32xf32>
    %c1_76 = arith.constant 1 : index
    %c0_77 = arith.constant 0 : index
    %c0_78 = arith.constant 0 : index
    %147 = vector.load %arg17[%c1_76, %c0_77, %c0_78] : memref<4x8x384xf32, #tpu.memory_space<vmem>>, vector<1x8x384xf32>
    %148 = vector.shape_cast %147 : vector<1x8x384xf32> to vector<8x384xf32>
    %149 = arith.truncf %146 : vector<8x32xf32> to vector<8x32xbf16>
    %cst_79 = arith.constant dense<0.000000e+00> : vector<8x384xf32>
    %150 = tpu.matmul %149, %112, %cst_79 {dimension_numbers = #tpu.dot_dimension_numbers<[1], [0], [0], [1], [0, 0, 1, 1], [], []>} : vector<8x32xbf16>, vector<32x384xbf16>, vector<8x384xf32> -> vector<8x384xf32>
    %151 = vector.extract_strided_slice %148 {offsets = [0, 0], sizes = [8, 32], strides = [1, 1]} : vector<8x384xf32> to vector<8x32xf32>
    %152 = vector.extract_strided_slice %150 {offsets = [0, 0], sizes = [8, 32], strides = [1, 1]} : vector<8x384xf32> to vector<8x32xf32>
    %153 = arith.addf %151, %152 : vector<8x32xf32>
    %154 = arith.negf %153 : vector<8x32xf32>
    %155 = math.exp %154 : vector<8x32xf32>
    %cst_80 = arith.constant 1.000000e+00 : f32
    %156 = vector.broadcast %cst_80 : f32 to vector<8x32xf32>
    %157 = arith.addf %156, %155 : vector<8x32xf32>
    %158 = arith.divf %156, %157 : vector<8x32xf32>
    %159 = vector.extract_strided_slice %148 {offsets = [0, 128], sizes = [8, 32], strides = [1, 1]} : vector<8x384xf32> to vector<8x32xf32>
    %160 = vector.extract_strided_slice %150 {offsets = [0, 128], sizes = [8, 32], strides = [1, 1]} : vector<8x384xf32> to vector<8x32xf32>
    %161 = arith.addf %159, %160 : vector<8x32xf32>
    %162 = arith.negf %161 : vector<8x32xf32>
    %163 = math.exp %162 : vector<8x32xf32>
    %cst_81 = arith.constant 1.000000e+00 : f32
    %164 = vector.broadcast %cst_81 : f32 to vector<8x32xf32>
    %165 = arith.addf %164, %163 : vector<8x32xf32>
    %166 = arith.divf %164, %165 : vector<8x32xf32>
    %167 = vector.extract_strided_slice %148 {offsets = [0, 256], sizes = [8, 32], strides = [1, 1]} : vector<8x384xf32> to vector<8x32xf32>
    %168 = vector.extract_strided_slice %150 {offsets = [0, 256], sizes = [8, 32], strides = [1, 1]} : vector<8x384xf32> to vector<8x32xf32>
    %169 = vector.broadcast %113 : vector<1x32xf32> to vector<8x32xf32>
    %170 = arith.addf %168, %169 : vector<8x32xf32>
    %171 = arith.mulf %158, %170 : vector<8x32xf32>
    %172 = arith.addf %167, %171 : vector<8x32xf32>
    %173 = math.tanh %172 : vector<8x32xf32>
    %cst_82 = arith.constant 1.000000e+00 : f32
    %174 = vector.broadcast %cst_82 : f32 to vector<8x32xf32>
    %175 = arith.subf %174, %166 : vector<8x32xf32>
    %176 = arith.mulf %175, %173 : vector<8x32xf32>
    %177 = arith.mulf %166, %146 : vector<8x32xf32>
    %178 = arith.addf %176, %177 : vector<8x32xf32>
    %c2_83 = arith.constant 2 : index
    %c0_84 = arith.constant 0 : index
    %c0_85 = arith.constant 0 : index
    %179 = vector.load %arg17[%c2_83, %c0_84, %c0_85] : memref<4x8x384xf32, #tpu.memory_space<vmem>>, vector<1x8x384xf32>
    %180 = vector.shape_cast %179 : vector<1x8x384xf32> to vector<8x384xf32>
    %181 = arith.truncf %178 : vector<8x32xf32> to vector<8x32xbf16>
    %cst_86 = arith.constant dense<0.000000e+00> : vector<8x384xf32>
    %182 = tpu.matmul %181, %112, %cst_86 {dimension_numbers = #tpu.dot_dimension_numbers<[1], [0], [0], [1], [0, 0, 1, 1], [], []>} : vector<8x32xbf16>, vector<32x384xbf16>, vector<8x384xf32> -> vector<8x384xf32>
    %183 = vector.extract_strided_slice %180 {offsets = [0, 0], sizes = [8, 32], strides = [1, 1]} : vector<8x384xf32> to vector<8x32xf32>
    %184 = vector.extract_strided_slice %182 {offsets = [0, 0], sizes = [8, 32], strides = [1, 1]} : vector<8x384xf32> to vector<8x32xf32>
    %185 = arith.addf %183, %184 : vector<8x32xf32>
    %186 = arith.negf %185 : vector<8x32xf32>
    %187 = math.exp %186 : vector<8x32xf32>
    %cst_87 = arith.constant 1.000000e+00 : f32
    %188 = vector.broadcast %cst_87 : f32 to vector<8x32xf32>
    %189 = arith.addf %188, %187 : vector<8x32xf32>
    %190 = arith.divf %188, %189 : vector<8x32xf32>
    %191 = vector.extract_strided_slice %180 {offsets = [0, 128], sizes = [8, 32], strides = [1, 1]} : vector<8x384xf32> to vector<8x32xf32>
    %192 = vector.extract_strided_slice %182 {offsets = [0, 128], sizes = [8, 32], strides = [1, 1]} : vector<8x384xf32> to vector<8x32xf32>
    %193 = arith.addf %191, %192 : vector<8x32xf32>
    %194 = arith.negf %193 : vector<8x32xf32>
    %195 = math.exp %194 : vector<8x32xf32>
    %cst_88 = arith.constant 1.000000e+00 : f32
    %196 = vector.broadcast %cst_88 : f32 to vector<8x32xf32>
    %197 = arith.addf %196, %195 : vector<8x32xf32>
    %198 = arith.divf %196, %197 : vector<8x32xf32>
    %199 = vector.extract_strided_slice %180 {offsets = [0, 256], sizes = [8, 32], strides = [1, 1]} : vector<8x384xf32> to vector<8x32xf32>
    %200 = vector.extract_strided_slice %182 {offsets = [0, 256], sizes = [8, 32], strides = [1, 1]} : vector<8x384xf32> to vector<8x32xf32>
    %201 = vector.broadcast %113 : vector<1x32xf32> to vector<8x32xf32>
    %202 = arith.addf %200, %201 : vector<8x32xf32>
    %203 = arith.mulf %190, %202 : vector<8x32xf32>
    %204 = arith.addf %199, %203 : vector<8x32xf32>
    %205 = math.tanh %204 : vector<8x32xf32>
    %cst_89 = arith.constant 1.000000e+00 : f32
    %206 = vector.broadcast %cst_89 : f32 to vector<8x32xf32>
    %207 = arith.subf %206, %198 : vector<8x32xf32>
    %208 = arith.mulf %207, %205 : vector<8x32xf32>
    %209 = arith.mulf %198, %178 : vector<8x32xf32>
    %210 = arith.addf %208, %209 : vector<8x32xf32>
    %c3_90 = arith.constant 3 : index
    %c0_91 = arith.constant 0 : index
    %c0_92 = arith.constant 0 : index
    %211 = vector.load %arg17[%c3_90, %c0_91, %c0_92] : memref<4x8x384xf32, #tpu.memory_space<vmem>>, vector<1x8x384xf32>
    %212 = vector.shape_cast %211 : vector<1x8x384xf32> to vector<8x384xf32>
    %213 = arith.truncf %210 : vector<8x32xf32> to vector<8x32xbf16>
    %cst_93 = arith.constant dense<0.000000e+00> : vector<8x384xf32>
    %214 = tpu.matmul %213, %112, %cst_93 {dimension_numbers = #tpu.dot_dimension_numbers<[1], [0], [0], [1], [0, 0, 1, 1], [], []>} : vector<8x32xbf16>, vector<32x384xbf16>, vector<8x384xf32> -> vector<8x384xf32>
    %215 = vector.extract_strided_slice %212 {offsets = [0, 0], sizes = [8, 32], strides = [1, 1]} : vector<8x384xf32> to vector<8x32xf32>
    %216 = vector.extract_strided_slice %214 {offsets = [0, 0], sizes = [8, 32], strides = [1, 1]} : vector<8x384xf32> to vector<8x32xf32>
    %217 = arith.addf %215, %216 : vector<8x32xf32>
    %218 = arith.negf %217 : vector<8x32xf32>
    %219 = math.exp %218 : vector<8x32xf32>
    %cst_94 = arith.constant 1.000000e+00 : f32
    %220 = vector.broadcast %cst_94 : f32 to vector<8x32xf32>
    %221 = arith.addf %220, %219 : vector<8x32xf32>
    %222 = arith.divf %220, %221 : vector<8x32xf32>
    %223 = vector.extract_strided_slice %212 {offsets = [0, 128], sizes = [8, 32], strides = [1, 1]} : vector<8x384xf32> to vector<8x32xf32>
    %224 = vector.extract_strided_slice %214 {offsets = [0, 128], sizes = [8, 32], strides = [1, 1]} : vector<8x384xf32> to vector<8x32xf32>
    %225 = arith.addf %223, %224 : vector<8x32xf32>
    %226 = arith.negf %225 : vector<8x32xf32>
    %227 = math.exp %226 : vector<8x32xf32>
    %cst_95 = arith.constant 1.000000e+00 : f32
    %228 = vector.broadcast %cst_95 : f32 to vector<8x32xf32>
    %229 = arith.addf %228, %227 : vector<8x32xf32>
    %230 = arith.divf %228, %229 : vector<8x32xf32>
    %231 = vector.extract_strided_slice %212 {offsets = [0, 256], sizes = [8, 32], strides = [1, 1]} : vector<8x384xf32> to vector<8x32xf32>
    %232 = vector.extract_strided_slice %214 {offsets = [0, 256], sizes = [8, 32], strides = [1, 1]} : vector<8x384xf32> to vector<8x32xf32>
    %233 = vector.broadcast %113 : vector<1x32xf32> to vector<8x32xf32>
    %234 = arith.addf %232, %233 : vector<8x32xf32>
    %235 = arith.mulf %222, %234 : vector<8x32xf32>
    %236 = arith.addf %231, %235 : vector<8x32xf32>
    %237 = math.tanh %236 : vector<8x32xf32>
    %cst_96 = arith.constant 1.000000e+00 : f32
    %238 = vector.broadcast %cst_96 : f32 to vector<8x32xf32>
    %239 = arith.subf %238, %230 : vector<8x32xf32>
    %240 = arith.mulf %239, %237 : vector<8x32xf32>
    %241 = arith.mulf %230, %210 : vector<8x32xf32>
    %242 = arith.addf %240, %241 : vector<8x32xf32>
    %c0_97 = arith.constant 0 : index
    %c0_98 = arith.constant 0 : index
    %243 = vector.load %arg16[%c0_97, %c0_98] : memref<8x32xf32, #tpu.memory_space<vmem>>, vector<8x32xf32>
    tpu.vector_store %arg16[%c0_97, %c0_98], %242 {strides = array<i32>} : memref<8x32xf32, #tpu.memory_space<vmem>>, vector<8x32xf32>,
    %244 = arith.truncf %242 : vector<8x32xf32> to vector<8x32xbf16>
    %c0_99 = arith.constant 0 : index
    %c0_100 = arith.constant 0 : index
    %245 = vector.load %arg12[%c0_99, %c0_100] : memref<32x8xbf16, #tpu.memory_space<vmem>>, vector<32x8xbf16>
    %cst_101 = arith.constant dense<0.000000e+00> : vector<8x8xf32>
    %246 = tpu.matmul %244, %245, %cst_101 {dimension_numbers = #tpu.dot_dimension_numbers<[1], [0], [0], [1], [0, 0, 1, 1], [], []>} : vector<8x32xbf16>, vector<32x8xbf16>, vector<8x8xf32> -> vector<8x8xf32>
    %c0_102 = arith.constant 0 : index
    %c0_103 = arith.constant 0 : index
    %247 = vector.load %arg13[%c0_102, %c0_103] : memref<1x8xf32, #tpu.memory_space<vmem>>, vector<1x8xf32>
    %248 = vector.broadcast %247 : vector<1x8xf32> to vector<8x8xf32>
    %249 = arith.addf %246, %248 : vector<8x8xf32>
    %c0_104 = arith.constant 0 : index
    %c0_105 = arith.constant 0 : index
    %250 = vector.load %arg15[%c0_104, %c0_105] : memref<8x8xf32, #tpu.memory_space<vmem>>, vector<8x8xf32>
    tpu.vector_store %arg15[%c0_104, %c0_105], %249 {strides = array<i32>} : memref<8x8xf32, #tpu.memory_space<vmem>>, vector<8x8xf32>,
    return
  }
  func.func @transform_0(%arg0: i32) -> (i32, i32, i32) {
    %c0_i32 = arith.constant 0 : i32
    %c0_i32_0 = arith.constant 0 : i32
    %c0_i32_1 = arith.constant 0 : i32
    return %c0_i32, %arg0, %c0_i32_0 : i32, i32, i32
  }
  func.func @transform_1(%arg0: i32) -> (i32, i32) {
    %c0_i32 = arith.constant 0 : i32
    %c0_i32_0 = arith.constant 0 : i32
    %c0_i32_1 = arith.constant 0 : i32
    return %c0_i32, %c0_i32_0 : i32, i32
  }
  func.func @transform_2(%arg0: i32) -> (i32, i32) {
    %c0_i32 = arith.constant 0 : i32
    %c0_i32_0 = arith.constant 0 : i32
    %c0_i32_1 = arith.constant 0 : i32
    return %c0_i32, %c0_i32_0 : i32, i32
  }
  func.func @transform_3(%arg0: i32) -> (i32, i32) {
    %c0_i32 = arith.constant 0 : i32
    %c0_i32_0 = arith.constant 0 : i32
    %c0_i32_1 = arith.constant 0 : i32
    return %c0_i32, %c0_i32_0 : i32, i32
  }
  func.func @transform_4(%arg0: i32) -> (i32, i32) {
    %c0_i32 = arith.constant 0 : i32
    %c0_i32_0 = arith.constant 0 : i32
    %c0_i32_1 = arith.constant 0 : i32
    return %c0_i32, %c0_i32_0 : i32, i32
  }
  func.func @transform_5(%arg0: i32) -> (i32, i32) {
    %c0_i32 = arith.constant 0 : i32
    %c0_i32_0 = arith.constant 0 : i32
    %c0_i32_1 = arith.constant 0 : i32
    return %c0_i32, %c0_i32_0 : i32, i32
  }
  func.func @transform_6(%arg0: i32) -> (i32, i32) {
    %c0_i32 = arith.constant 0 : i32
    %c0_i32_0 = arith.constant 0 : i32
    %c0_i32_1 = arith.constant 0 : i32
    return %c0_i32, %c0_i32_0 : i32, i32
  }
  func.func @transform_7(%arg0: i32) -> (i32, i32) {
    %c0_i32 = arith.constant 0 : i32
    %c0_i32_0 = arith.constant 0 : i32
    %c0_i32_1 = arith.constant 0 : i32
    return %c0_i32, %c0_i32_0 : i32, i32
  }
  func.func @transform_8(%arg0: i32) -> (i32, i32) {
    %c0_i32 = arith.constant 0 : i32
    %c0_i32_0 = arith.constant 0 : i32
    %c0_i32_1 = arith.constant 0 : i32
    return %c0_i32, %c0_i32_0 : i32, i32
  }
  func.func @transform_9(%arg0: i32) -> (i32, i32) {
    %c0_i32 = arith.constant 0 : i32
    %c0_i32_0 = arith.constant 0 : i32
    %c0_i32_1 = arith.constant 0 : i32
    return %c0_i32, %c0_i32_0 : i32, i32
  }
  func.func @transform_10(%arg0: i32) -> (i32, i32) {
    %c0_i32 = arith.constant 0 : i32
    %c0_i32_0 = arith.constant 0 : i32
    %c0_i32_1 = arith.constant 0 : i32
    return %c0_i32, %c0_i32_0 : i32, i32
  }
  func.func @transform_11(%arg0: i32) -> (i32, i32) {
    %c0_i32 = arith.constant 0 : i32
    %c0_i32_0 = arith.constant 0 : i32
    %c0_i32_1 = arith.constant 0 : i32
    return %c0_i32, %c0_i32_0 : i32, i32
  }
  func.func @transform_12(%arg0: i32) -> (i32, i32) {
    %c0_i32 = arith.constant 0 : i32
    %c0_i32_0 = arith.constant 0 : i32
    %c0_i32_1 = arith.constant 0 : i32
    return %c0_i32, %c0_i32_0 : i32, i32
  }
  func.func @transform_13(%arg0: i32) -> (i32, i32) {
    %c0_i32 = arith.constant 0 : i32
    %c0_i32_0 = arith.constant 0 : i32
    return %arg0, %c0_i32 : i32, i32
  }
  func.func @transform_14(%arg0: i32) -> (i32, i32) {
    %c0_i32 = arith.constant 0 : i32
    %c0_i32_0 = arith.constant 0 : i32
    return %arg0, %c0_i32 : i32, i32
  }
  func.func @transform_15(%arg0: i32) -> (i32, i32) {
    %c0_i32 = arith.constant 0 : i32
    %c0_i32_0 = arith.constant 0 : i32
    return %arg0, %c0_i32 : i32, i32
  }
}

</mosaic_0001>

<bundles_post_ra>
// kernel: tpu_custom_call.1
= control target key start
LH: loop header
LB: loop body
LE: loop exit
PB: predicated region body
PF: predicated region fallthrough
CT: control target
= control target key end

     0   :  { %s5044_s0 = inlined_call_operand.vmem [shape: bf16[4,16,256], index: 0, kind: input, shape index: {}]   ;;  %s5045_s1 = inlined_call_operand.vmem [shape: bf16[256,288], index: 1, kind: input, shape index: {}]   ;;  %s5046_s2 = inlined_call_operand.vmem [shape: f32[1,288], index: 2, kind: input, shape index: {}]   ;;  %s5047_s3 = inlined_call_operand.vmem [shape: bf16[288,32], index: 3, kind: input, shape index: {}]   ;;  %s5048_s4 = inlined_call_operand.vmem [shape: f32[1,32], index: 4, kind: input, shape index: {}]   ;;  %s5049_s5 = inlined_call_operand.vmem [shape: bf16[32,16], index: 5, kind: input, shape index: {}]   ;;  %s5050_s6 = inlined_call_operand.vmem [shape: f32[1,16], index: 6, kind: input, shape index: {}]   ;;  %s5051_s7 = inlined_call_operand.vmem [shape: bf16[16,384], index: 7, kind: input, shape index: {}]   ;;  %s5052_s8 = inlined_call_operand.vmem [shape: f32[1,384], index: 8, kind: input, shape index: {}]   ;;  %s5053_s9 = inlined_call_operand.vmem [shape: bf16[32,384], index: 9, kind: input, shape index: {}]   ;;  %s5054_s10 = inlined_call_operand.vmem [shape: f32[1,32], index: 10, kind: input, shape index: {}]   ;;  %s5055_s11 = inlined_call_operand.vmem [shape: bf16[32,8], index: 11, kind: input, shape index: {}]   ;;  %s5056_s12 = inlined_call_operand.vmem [shape: f32[1,8], index: 12, kind: input, shape index: {}]   ;;  %s5057_s13 = inlined_call_operand.vmem [shape: f32[16,32], index: 13, kind: input, shape index: {}]   ;;  %s5058_s14 = inlined_call_operand.vmem [shape: f32[16,8], index: 14, kind: output, shape index: {0}]   ;;  %s5059_s15 = inlined_call_operand.hbm [shape: f32[16,32], index: 15, kind: output, shape index: {1}]  }
   0x1   :  { %5131 = sst [smem:[#allocation43_spill]] %s5044_s0 }
   0x2   :  { %5132 = sst [smem:[#allocation44_spill]] %s5045_s1 }
   0x3   :  { %21 = vsyncpa [#allocation5], 0 }
   0x4   :  { %23 = vsyncpa [#allocation5 + $0x1], 0  ;;  %s3945_s18 = smov 0   ;;  %s3947_s19 = smov 0  }
   0x5   :  { %s3949_s20 = smov 0   ;;  %s3951_s21 = smov 0  }
   0x6 LB: > { %5133 = sst [smem:[#allocation7_spill]] %s3851_s19  ;;  %s3966_s22 = sadd.s32 4294967295, %s3859_s21   ;;  %s3859_s21 = sphi %s3951_s21, %s5232_s21   ;;  %s3855_s20 = sphi %s3949_s20, %s5235_s20   ;;  %s3851_s19 = sphi %s3947_s19, %s5234_s19   ;;  %s3847_s18 = sphi %s3945_s18, %s5233_s18  }
   0x7   : > { %5134 = sst [smem:[#allocation8_spill]] %s3855_s20  ;;  %s3053_s23 = sadd.s32 4294967294, %s3859_s21  }
   0x8   : > { %5135 = sst [smem:[#allocation9_spill]] %s3859_s21  ;;  %s3970_s24 = sadd.s32 1, %s3859_s21  }
   0x9   : > { %5136 = sst [smem:[#allocation10_spill]] %s3970_s24  ;;  %s36_s25 = sadd.s32 1, %s3855_s20 }
   0xa   : > { %s33_s26 = ssub.s32 %s3859_s21, %s3970_s24  ;;  %p43_p0 = scmp.ne.s32.totalorder %s3855_s20, %s3851_s19 }
   0xb   : > { %p34_p1 = scmp.eq.s32.totalorder %s33_s26, 0  ;;  %p44_p2 = scmp.eq.s32.totalorder %s3859_s21, 0 }
   0xc   : > { %p377_p3 = scmp.eq.s32.totalorder %s3966_s22, 1  ;;  %p382_p4 = scmp.ne.s32.totalorder %s3851_s19, %s3847_s18 }
   0xd   : > { %s3982_s27 = scalar_select %p34_p1, %s3855_s20, %s36_s25  }
   0xe   : > { %p45_p5 = por %p44_p2, %p43_p0  ;;  %p3984_p6 = por %p377_p3, %p43_p0 }
   0xf   : > { %5137 = sst [smem:[#allocation11_spill]] %s3982_s27  ;;  %p383_p7 = scmp.eq.s32.totalorder %s3053_s23, 1 }
  0x10   : > { %p3055_p9 = scmp.ge.s32.totalorder %s3859_s21, 2 }
  0x11   : > { %p3988_p8 = por %p383_p7, %p382_p4 }
  0x12   : > { %435 = sbr.rel (%p3055_p9) target bundleno = 37 (0x25), region = 64 }
  0x19   : > { %438 = sbr.rel (!%p45_p5) target bundleno = 37 (0x25), region = 68  ;;  %s440_s30 = sand.u32 (%p45_p5), 1, %s3855_s20  }
  0x1a   : > { %s3195_s16 = sshll.u32 (%p45_p5), %s3859_s21, 3  ;;  %s3056_s17 = sshll.u32 (%p45_p5), %s440_s30, 5 }
  0x1b   : > { %s5140_s0 = sld [smem:[#allocation43_spill]] (%p45_p5)  ;;  %s442_s23 = scalar_lea.vmem (%p45_p5), [#allocation3], %s3056_s17 }
  0x21   : > { %s445_s27 = scalar_lea.vmem %s5140_s0, %s3195_s16 }
  0x22   : > { %v479_v0 = vld [vmem:[%s445_s27] sm:$0xff]  ;;  %v481_v1 = vld [vmem:[%s445_s27 + $0x10] sm:$0xff] }
  0x23   : > { %v483_v2 = vld [vmem:[%s445_s27 + $0x20] sm:$0xff]  ;;  %480 = vst [vmem:[%s442_s23] sm:$0xff] %v479_v0  ;;  %482 = vst [vmem:[%s442_s23 + $0x8] sm:$0xff] %v481_v1  ;;  %v485_v3 = vld [vmem:[%s445_s27 + $0x30] sm:$0xff] }
  0x24   : > { %484 = vst [vmem:[%s442_s23 + $0x10] sm:$0xff] %v483_v2  ;;  %486 = vst [vmem:[%s442_s23 + $0x18] sm:$0xff] %v485_v3 }
  0x25 PF: > { %p3059_p10 = scmp.ge.s32.totalorder %s3859_s21, 1  ;;  %p498_p11 = scmp.lt.s32.totalorder %s3859_s21, 3 }
  0x27   : > { %p499_p12 = pnand %p3059_p10, %p498_p11 }
  0x29   : > { %502 = sbr.rel (%p499_p12) target bundleno = 4222 (0x107e), region = 110 }
  0x30   : > { %s5141_s1 = sld [smem:[#allocation44_spill]]  ;;  %s4155_s27 = sand.u32 1, %s3851_s19   ;;  %v4243_v45 = vld [vmem:[%s5047_s3 + $0x40] sm:$0xff]   ;;  %v4267_v50 = vld [vmem:[%s5047_s3 + $0x48] sm:$0xff]   ;;  %v4291_v54 = vld [vmem:[%s5047_s3 + $0x50] sm:$0xff]   ;;  %vm3862_vm0 = vmmov 0  }
  0x31   : > { %s3060_s26 = sshll.u32 %s4155_s27, 5  ;;  %v4260_v49 = vld [vmem:[%s5047_s3] sm:$0xff]   ;;  %v4284_v53 = vld [vmem:[%s5047_s3 + $0x8] sm:$0xff]   ;;  %v4301_v56 = vld [vmem:[%s5047_s3 + $0x10] sm:$0xff]   ;;  %vm1162_vm1 = vcmask 261120   ;;  %vm1343_vm2 = vcmask 130048  }
  0x32   : > { %s4223_s17 = scalar_lea.vmem [#allocation3], %s3060_s26  ;;  %v4311_v58 = vld [vmem:[%s5047_s3 + $0x58] sm:$0xff]   ;;  %v4335_v62 = vld [vmem:[%s5047_s3 + $0x60] sm:$0xff]   ;;  %v4358_v1 = vld [vmem:[%s5047_s3 + $0x68] sm:$0xff]   ;;  %p560_p13 = scmp.lt.s32.totalorder %s3966_s22, 1 }
  0x33   : > { %v681_v41 = vld [vmem:[%s4223_s17] sm:$0xff]  ;;  %5150 = vst [vmem:[#allocation20_spill] sm:$0xff] %v4311_v58  ;;  %v4325_v60 = vld [vmem:[%s5047_s3 + $0x18] sm:$0xff]   ;;  %5154 = vst [vmem:[#allocation24_spill] sm:$0xff] %v4335_v62  ;;  %s3061_s26 = sshll.u32 %s4155_s27, 3  ;;  %s3192_s25 = sshll.u32 %s3966_s22, 7 }
  0x34   : > { %v3065_v43 = vcombine.high %v681_v41, %v681_v41  ;;  %v3064_v48 = vcombine.low %v681_v41, %v681_v41  ;;  %5152 = vst [vmem:[#allocation22_spill] sm:$0xff] %v4325_v60  ;;  %v4349_v0 = vld [vmem:[%s5047_s3 + $0x20] sm:$0xff]   ;;  %5157 = vst [vmem:[#allocation27_spill] sm:$0xff] %v4358_v1  ;;  %v4365_v2 = vld [vmem:[%s5047_s3 + $0x28] sm:$0xff]   ;;  %s4853_s24 = scalar_select %p560_p13, %s3966_s22, 1 }
  0x35   : > { %5156 = vst [vmem:[#allocation26_spill] sm:$0xff] %v4349_v0  ;;  %5158 = vst [vmem:[#allocation28_spill] sm:$0xff] %v4365_v2  ;;  %v4372_v3 = vld [vmem:[%s5047_s3 + $0x70] sm:$0xff]   ;;  %s559_s20 = scalar_lea.vmem [#allocation4], %s3061_s26  ;;  %s4998_s23 = scalar_lea.hbm %s5059_s15, %s3192_s25 }
  0x36   : > { %v4005_v4 = vld [vmem:[%s5141_s1 + $0x4] ss:$12 sps:$4 sm:$0xff]   ;;  %v4010_v5 = vld [vmem:[%s5141_s1] ss:$12 sps:$4 sm:$0xff]   ;;  %v4016_v6 = vld [vmem:[%s5141_s1 + $0x1c] ss:$12 sps:$4 sm:$0xff]   ;;  %993 = vmatprep.mubr.bf16.mxu0 %v3065_v43  ;;  %1034 = vmatprep.mubr.bf16.mxu1 %v3065_v43 }
  0x37   : > { %5142 = vst [vmem:[#allocation12_spill] sm:$0xff] %v4005_v4  ;;  %961 = vmatprep.subr.bf16.mxu0 %v4005_v4  ;;  %v4022_v7 = vld [vmem:[%s5141_s1 + $0x18] ss:$12 sps:$4 sm:$0xff]   ;;  %v4028_v8 = vld [vmem:[%s5141_s1 + $0x34] ss:$12 sps:$4 sm:$0xff]   ;;  %5159 = vst [vmem:[#allocation29_spill] sm:$0xff] %v4372_v3 }
  0x38   : > { %962 = vmatpush1.bf16.msra.mxu0 %v4010_v5  ;;  %v4034_v9 = vld [vmem:[%s5141_s1 + $0x30] ss:$12 sps:$4 sm:$0xff]   ;;  %v4040_v10 = vld [vmem:[%s5141_s1 + $0x4c] ss:$12 sps:$4 sm:$0xff]   ;;  %v4046_v11 = vld [vmem:[%s5141_s1 + $0x48] ss:$12 sps:$4 sm:$0xff]  }
  0x39   : > { %963 = vmatprep.subr.bf16.mxu0 %v4016_v6  ;;  %v4052_v12 = vld [vmem:[%s5141_s1 + $0x64] ss:$12 sps:$4 sm:$0xff]   ;;  %v4057_v13 = vld [vmem:[%s5141_s1 + $0xc8] ss:$12 sps:$4 sm:$0xff]   ;;  %v4067_v15 = vld [vmem:[%s5141_s1 + $0x60] ss:$12 sps:$4 sm:$0xff]  }
  0x3a   : > { %v4062_v14 = vld [vmem:[%s5141_s1 + $0x8] ss:$12 sps:$4 sm:$0xff]   ;;  %3196 = vmatprep.subr.bf16.mxu1 %v4057_v13  ;;  %v4075_v16 = vld [vmem:[%s5141_s1 + $0xe0] ss:$12 sps:$4 sm:$0xff]   ;;  %v4092_v19 = vld [vmem:[%s5141_s1 + $0x78] ss:$12 sps:$4 sm:$0xff]  }
  0x3b   : > { %3197 = vmatpush3.bf16.msra.mxu1 %v4062_v14  ;;  %v4081_v17 = vld [vmem:[%s5141_s1 + $0x7c] ss:$12 sps:$4 sm:$0xff]   ;;  %v4087_v18 = vld [vmem:[%s5141_s1 + $0x20] ss:$12 sps:$4 sm:$0xff]   ;;  %v4104_v21 = vld [vmem:[%s5141_s1 + $0xf8] ss:$12 sps:$4 sm:$0xff]  }
  0x3c   : > { %964 = vmatpush1.bf16.msra.mxu0 %v4022_v7  ;;  %3198 = vmatprep.subr.bf16.mxu1 %v4075_v16  ;;  %v4098_v20 = vld [vmem:[%s5141_s1 + $0x94] ss:$12 sps:$4 sm:$0xff]   ;;  %v4110_v22 = vld [vmem:[%s5141_s1 + $0x38] ss:$12 sps:$4 sm:$0xff]   ;;  %v4116_v23 = vld [vmem:[%s5141_s1 + $0x90] ss:$12 sps:$4 sm:$0xff]  }
  0x3d   : > { %965 = vmatprep.subr.bf16.mxu0 %v4028_v8  ;;  %v4121_v24 = vld [vmem:[%s5141_s1 + $0x110] ss:$12 sps:$4 sm:$0xff]   ;;  %v4134_v26 = vld [vmem:[%s5141_s1 + $0xac] ss:$12 sps:$4 sm:$0xff]   ;;  %v4140_v27 = vld [vmem:[%s5141_s1 + $0x128] ss:$12 sps:$4 sm:$0xff]  }
  0x3e   : > { %v4128_v25 = vld [vmem:[%s5141_s1 + $0x50] ss:$12 sps:$4 sm:$0xff]   ;;  %v4145_v28 = vld [vmem:[%s5141_s1 + $0xa8] ss:$12 sps:$4 sm:$0xff]   ;;  %v4167_v31 = vld [vmem:[%s5141_s1 + $0x140] ss:$12 sps:$4 sm:$0xff]  }
  0x3f   : > { %3199 = vmatpush3.bf16.msra.mxu1 %v4087_v18  ;;  %v4152_v29 = vld [vmem:[%s5141_s1 + $0x68] ss:$12 sps:$4 sm:$0xff]   ;;  %v4161_v30 = vld [vmem:[%s5141_s1 + $0xc4] ss:$12 sps:$4 sm:$0xff]   ;;  %v4172_v32 = vld [vmem:[%s5141_s1 + $0xc0] ss:$12 sps:$4 sm:$0xff]  }
  0x40   : > { %966 = vmatpush1.bf16.msra.mxu0 %v4034_v9  ;;  %3200 = vmatprep.subr.bf16.mxu1 %v4104_v21  ;;  %v4179_v33 = vld [vmem:[%s5141_s1 + $0x80] ss:$12 sps:$4 sm:$0xff]   ;;  %v4186_v34 = vld [vmem:[%s5141_s1 + $0xdc] ss:$12 sps:$4 sm:$0xff]   ;;  %v4192_v35 = vld [vmem:[%s5141_s1 + $0x158] ss:$12 sps:$4 sm:$0xff]  }
  0x41   : > { %967 = vmatprep.subr.bf16.mxu0 %v4040_v10  ;;  %v4197_v36 = vld [vmem:[%s5141_s1 + $0xd8] ss:$12 sps:$4 sm:$0xff]   ;;  %v4202_v37 = vld [vmem:[%s5141_s1 + $0xf4] ss:$12 sps:$4 sm:$0xff]   ;;  %v4216_v39 = vld [vmem:[%s5141_s1 + $0x170] ss:$12 sps:$4 sm:$0xff]  }
  0x42   : > { %v4209_v38 = vld [vmem:[%s5141_s1 + $0x98] ss:$12 sps:$4 sm:$0xff]   ;;  %v4221_v40 = vld [vmem:[%s5141_s1 + $0xf0] ss:$12 sps:$4 sm:$0xff]   ;;  %v4248_v46 = vld [vmem:[%s5141_s1 + $0x108] ss:$12 sps:$4 sm:$0xff]  }
  0x43   : > { %3201 = vmatpush3.bf16.msra.mxu1 %v4110_v22  ;;  %v4229_v42 = vld [vmem:[%s5141_s1 + $0x10c] ss:$12 sps:$4 sm:$0xff]   ;;  %v4236_v44 = vld [vmem:[%s5141_s1 + $0xb0] ss:$12 sps:$4 sm:$0xff]   ;;  %5144 = vst [vmem:[#allocation14_spill] sm:$0xff] %v4248_v46  ;;  %v4383_v43 = vld [vmem:[%s5047_s3 + $0x80] sm:$0xff]  }
  0x44   : > { %968 = vmatpush1.bf16.msra.mxu0 %v4046_v11  ;;  %3202 = vmatprep.subr.bf16.mxu1 %v4121_v24  ;;  %5143 = vst [vmem:[#allocation13_spill] sm:$0xff] %v4229_v42  ;;  %v4253_v47 = vld [vmem:[%s5141_s1 + $0x124] ss:$12 sps:$4 sm:$0xff]   ;;  %v4272_v51 = vld [vmem:[%s5141_s1 + $0x120] ss:$12 sps:$4 sm:$0xff]   ;;  %5161 = vst [vmem:[#allocation31_spill] sm:$0xff] %v4383_v43 }
  0x45   : > { %969 = vmatprep.subr.bf16.mxu0 %v4052_v12  ;;  %5145 = vst [vmem:[#allocation15_spill] sm:$0xff] %v4253_v47  ;;  %5146 = vst [vmem:[#allocation16_spill] sm:$0xff] %v4272_v51  ;;  %v4277_v52 = vld [vmem:[%s5141_s1 + $0x13c] ss:$12 sps:$4 sm:$0xff]   ;;  %v4296_v55 = vld [vmem:[%s5141_s1 + $0x138] ss:$12 sps:$4 sm:$0xff]  }
  0x46   : > { %5147 = vst [vmem:[#allocation17_spill] sm:$0xff] %v4277_v52  ;;  %5148 = vst [vmem:[#allocation18_spill] sm:$0xff] %v4296_v55  ;;  %v4306_v57 = vld [vmem:[%s5141_s1 + $0x154] ss:$12 sps:$4 sm:$0xff]   ;;  %v4320_v59 = vld [vmem:[%s5141_s1 + $0x150] ss:$12 sps:$4 sm:$0xff]  }
  0x47   : > { %3203 = vmatpush3.bf16.msra.mxu1 %v4128_v25  ;;  %5149 = vst [vmem:[#allocation19_spill] sm:$0xff] %v4306_v57  ;;  %5151 = vst [vmem:[#allocation21_spill] sm:$0xff] %v4320_v59  ;;  %v4330_v61 = vld [vmem:[%s5141_s1 + $0x16c] ss:$12 sps:$4 sm:$0xff]   ;;  %v4344_v63 = vld [vmem:[%s5141_s1 + $0x168] ss:$12 sps:$4 sm:$0xff]  }
  0x48   : > { %970 = vmatpush1.bf16.msra.mxu0 %v4067_v15  ;;  %3204 = vmatprep.subr.bf16.mxu1 %v4140_v27  ;;  %5153 = vst [vmem:[#allocation23_spill] sm:$0xff] %v4330_v61  ;;  %5155 = vst [vmem:[#allocation25_spill] sm:$0xff] %v4344_v63  ;;  %v4377_v41 = vld [vmem:[%s5047_s3 + $0x30] sm:$0xff]   ;;  %s5130_s0 = sshll.u32 %s4853_s24, 3  ;;  %s2936_s30 = scalar_lea.sflag [#allocation5], %s4155_s27 }
  0x49   : > { %971 = vmatprep.subr.bf16.mxu0 %v4081_v17  ;;  %5160 = vst [vmem:[#allocation30_spill] sm:$0xff] %v4377_v41  ;;  %s563_s16 = scalar_lea.vmem %s5057_s13, %s5130_s0  ;;  %s3864_s0 = smov [#allocation4]  }
  0x4a   : > { %s3801_s26 = sshll.u32 %s3864_s0, 4  ;;  %s3802_s26 = int_to_ptr.vmem [resolvable:$false] %s3801_s26 }
  0x4b   : > { %3205 = vmatpush3.bf16.msra.mxu1 %v4152_v29 }
  0x4c   : > { %972 = vmatpush1.bf16.msra.mxu0 %v4092_v19  ;;  %3206 = vmatprep.subr.bf16.mxu1 %v4167_v31 }
  0x4d   : > { %973 = vmatprep.subr.bf16.mxu0 %v4098_v20 }
  0x4f   : > { %3207 = vmatpush3.bf16.msra.mxu1 %v4179_v33 }
  0x50   : > { %974 = vmatpush1.bf16.msra.mxu0 %v4116_v23  ;;  %3208 = vmatprep.subr.bf16.mxu1 %v4192_v35 }
  0x51   : > { %975 = vmatprep.subr.bf16.mxu0 %v4134_v26 }
  0x53   : > { %3209 = vmatpush3.bf16.msra.mxu1 %v4209_v38 }
  0x54   : > { %976 = vmatpush1.bf16.msra.mxu0 %v4145_v28  ;;  %3210 = vmatprep.subr.bf16.mxu1 %v4216_v39 }
  0x55   : > { %977 = vmatprep.subr.bf16.mxu0 %v4161_v30 }
  0x57   : > { %3211 = vmatpush3.bf16.msra.mxu1 %v4236_v44 }
  0x58   : > { %978 = vmatpush1.bf16.msra.mxu0 %v4172_v32  ;;  %3218 = vmatprep.subr.bf16.mxu1 %v4243_v45 }
  0x59   : > { %979 = vmatprep.subr.bf16.mxu0 %v4186_v34 }
  0x5a   : > { %1035 = vmatmul.mubr.bf16.vlgmr.msra.gmra.mrb[0].mxu1 %v3064_v48 }
  0x5b   : > { %3219 = vmatpush3.bf16.msra.mxu1 %v4260_v49 }
  0x5c   : > { %980 = vmatpush1.bf16.msra.mxu0 %v4197_v36  ;;  %3220 = vmatprep.subr.bf16.mxu1 %v4267_v50 }
  0x5d   : > { %981 = vmatprep.subr.bf16.mxu0 %v4202_v37 }
  0x5f   : > { %3221 = vmatpush3.bf16.msra.mxu1 %v4284_v53 }
  0x60   : > { %982 = vmatpush1.bf16.msra.mxu0 %v4221_v40  ;;  %3222 = vmatprep.subr.bf16.mxu1 %v4291_v54 }
  0x61   : > { %983 = vmatprep.subr.bf16.mxu0 %v4229_v42 }
  0x63   : > { %3223 = vmatpush3.bf16.msra.mxu1 %v4301_v56 }
  0x64   : > { %984 = vmatpush1.bf16.msra.mxu0 %v4248_v46  ;;  %3224 = vmatprep.subr.bf16.mxu1 %v4311_v58 }
  0x65   : > { %985 = vmatprep.subr.bf16.mxu0 %v4253_v47 }
  0x67   : > { %3225 = vmatpush3.bf16.msra.mxu1 %v4325_v60 }
  0x68   : > { %986 = vmatpush1.bf16.msra.mxu0 %v4272_v51  ;;  %3226 = vmatprep.subr.bf16.mxu1 %v4335_v62 }
  0x69   : > { %987 = vmatprep.subr.bf16.mxu0 %v4277_v52 }
  0x6b   : > { %3227 = vmatpush3.bf16.msra.mxu1 %v4349_v0 }
  0x6c   : > { %988 = vmatpush1.bf16.msra.mxu0 %v4296_v55  ;;  %3228 = vmatprep.subr.bf16.mxu1 %v4358_v1 }
  0x6d   : > { %989 = vmatprep.subr.bf16.mxu0 %v4306_v57 }
  0x6f   : > { %3229 = vmatpush3.bf16.msra.mxu1 %v4365_v2 }
  0x70   : > { %990 = vmatpush1.bf16.msra.mxu0 %v4320_v59  ;;  %3230 = vmatprep.subr.bf16.mxu1 %v4372_v3  ;;  %v633_v3 = vld [vmem:[%s5046_s2] sm:$0x7] }
  0x71   : > { %991 = vmatprep.subr.bf16.mxu0 %v4330_v61  ;;  %v4396_v61 = vld [vmem:[%s5047_s3 + $0x38] sm:$0xff]  }
  0x72   : > { %5163 = vst [vmem:[#allocation33_spill] sm:$0xff] %v4396_v61 }
  0x73   : > { %3231 = vmatpush3.bf16.msra.mxu1 %v4377_v41  ;;  %v4403_v41 = vld [vmem:[%s5047_s3 + $0x88] sm:$0xff]  }
  0x74   : > { %992 = vmatpush1.bf16.msra.mxu0 %v4344_v63  ;;  %v4391_v63 = vld [vmem:[%s5047_s3 + $0x78] sm:$0xff]   ;;  %5164 = vst [vmem:[#allocation34_spill] sm:$0xff] %v4403_v41 }
  0x75   : > { %5162 = vst [vmem:[#allocation32_spill] sm:$0xff] %v4391_v63  ;;  %3232 = vmatprep.subr.bf16.mxu1 %v4391_v63 }
  0x77   : > { %994 = vmatmul.mubr.bf16.vlgmr.msra.gmra.mrb[0].mxu0 %v3064_v48  ;;  %v5091_v48 = vmov 0.0   ;;  %3233 = vmatpush3.bf16.msra.mxu1 %v4396_v61 }
  0x78   : > { %3419 = vmatprep.subr.bf16.mxu0 %v5091_v48  ;;  %3427 = vmatprep.subr.bf16.mxu1 %v5091_v48 }
  0x79   : > { %3420 = vmatpush3.bf16.msra.mxu0 %v4383_v43  ;;  %3423 = vmatprep.mubr.msk.bf16.mxu0 %vm3862_vm0, %v5091_v48  ;;  %v683_v43 = vlaneseq }
  0x7a   : > { %3421 = vmatprep.subr.bf16.mxu0 %v5091_v48 }
  0x7b   : > { %v4410_v59 = vshrl.u32 %v683_v43, 7 }
  0x7d   : > { %3422 = vmatpush3.bf16.msra.mxu0 %v4403_v41  ;;  %5165 = vst [vmem:[#allocation35_spill] sm:$0xff] %v4410_v59  ;;  %v5101_v63 = vsub.s32 2, %v4410_v59  ;;  %v5106_v0 = vsub.s32 0, %v4410_v59  ;;  %v5107_v51 = vsub.s32 1, %v4410_v59 }
  0x7f   : > { %v4418_v61 = vrot.slane %v633_v3, %v5101_v63  ;;  %v4426_v62 = vrot.slane %v633_v3, %v5106_v0  ;;  %v5169_v0 = vmov 0.0  }
  0x81   : > { %5166 = vst [vmem:[#allocation36_spill] sm:$0xff] %v4418_v61  ;;  %5167 = vst [vmem:[#allocation37_spill] sm:$0xff] %v4426_v62 }
 0x12d   : > { %v3212_v57 = vpop.f32.mrb[0].mxu1 }
 0x12e   : > { %v3213_v41 = vpop.f32.mrb[1].mxu1 }
 0x12f   : > { %v3214_v2 = vadd.f32 %v3213_v41, %v3212_v57  ;;  %v3215_v55 = vpop.f32.mrb[2].mxu1  ;;  %v4430_v57 = vrot.slane %v633_v3, %v5107_v51  ;;  %v4439_v3 = vld [vmem:[%s5049_s5] sm:$0xff]  }
 0x130   : > { %v3216_v1 = vpop.f32.mrb[3].mxu1  ;;  %5170 = vst [vmem:[#allocation39_spill] sm:$0xff] %v4439_v3 }
 0x131   : > { %v1037_v48 = vadd.f32 %v3214_v2, %v4418_v61  ;;  %5168 = vst [vmem:[#allocation38_spill] sm:$0xff] %v4430_v57 }
 0x133   : > { %v1044_v52 = vmax.f32 %v1037_v48, 0.0 }
 0x135   : > { %v1047_v43 = vpack.c.bf16 %v1044_v52, %v1044_v52 }
 0x137   : > { %3424 = vmatmul.mubr.msk.bf16.vlgmr.msra.gmra.mrb[4].mxu0 %vm1162_vm1, %v1047_v43 }
 0x14a   : > { %v995_v55 = vpop.f32.mrb[0].mxu0 }
 0x14b   : > { %v996_v1 = vadd.f32 %v995_v55, %v4426_v62  ;;  %v997_v2 = vpop.f32.mrb[1].mxu0  ;;  %v4446_v55 = vld [vmem:[%s5049_s5 + $0x8] sm:$0xff]  }
 0x14c   : > { %v998_v52 = vadd.f32 %v997_v2, %v4430_v57  ;;  %v999_v41 = vpop.f32.mrb[2].mxu0  ;;  %5171 = vst [vmem:[#allocation40_spill] sm:$0xff] %v4446_v55 }
 0x14d   : > { %v1042_v48 = vmax.f32 %v996_v1, 0.0  ;;  %v1000_v43 = vpop.f32.mrb[3].mxu0 }
 0x14e   : > { %v1043_v63 = vmax.f32 %v998_v52, 0.0  ;;  %v4466_v43 = vld [vmem:[%s5048_s4] ss:$0 sm:$0xff] }
 0x14f   : > { %v1045_v47 = vpack.c.bf16 %v1042_v48, %v1042_v48 }
 0x150   : > { %v1046_v61 = vpack.c.bf16 %v1043_v63, %v1043_v63 }
 0x152   : > { %1198 = vmatprep.mubr.bf16.mxu1 %v1046_v61  ;;  %v4458_v61 = vld [vmem:[%s5051_s7] ss:$12 sps:$4 sm:$0xff]  }
 0x153   : > { %1199 = vmatmul.mubr.bf16.vlgmr.msra.gmra.mrb[4].mxu1 %v1045_v47  ;;  %v4453_v47 = vld [vmem:[%s5051_s7 + $0x4] ss:$12 sps:$4 sm:$0xff]  }
 0x154   : > { %3431 = vmatprep.mubr.msk.bf16.mxu1 %vm3862_vm0, %v5169_v0  ;;  %3428 = vmatpush3.bf16.msra.mxu1 %v4439_v3  ;;  %5172 = vst [vmem:[#allocation41_spill] sm:$0xff] %v4453_v47 }
 0x155   : > { %3429 = vmatprep.subr.bf16.mxu1 %v5169_v0  ;;  %1347 = vmatprep.subr.bf16.mxu0 %v4453_v47 }
 0x156   : > { %1348 = vmatpush1.bf16.msra.mxu0 %v4458_v61 }
 0x157   : > { %1440 = vmatprep.subr.bf16.mxu0 %v4005_v4 }
 0x158   : > { %3430 = vmatpush3.bf16.msra.mxu1 %v4446_v55 }
 0x159   : > { %3435 = vmatprep.subr.bf16.mxu1 %v5169_v0 }
 0x20a   : > { %v1240_v63 = vpop.f32.mrb[4].mxu0 }
 0x20b   : > { %v3425_v1 = vpop.f32.mrb[5].mxu0 }
 0x20c   : > { %v1243_v2 = vpop.f32.mrb[6].mxu0  ;;  %v4475_v1 = vld [vmem:[%s5051_s7 + $0x8] ss:$12 sps:$4 sm:$0xff]  }
 0x20d   : > { %v3426_v52 = vpop.f32.mrb[7].mxu0  ;;  %v3143_v2 = vld [vmem:[%s4223_s17 + $0x8] sm:$0xff] }
 0x226   : > { %v3234_v41 = vpop.f32.mrb[4].mxu1 }
 0x227   : > { %v3235_v48 = vpop.f32.mrb[5].mxu1 }
 0x228   : > { %v3236_v51 = vadd.f32 %v3235_v48, %v3234_v41  ;;  %v3237_v59 = vpop.f32.mrb[6].mxu1  ;;  %v3145_v41 = vcombine.high %v3143_v2, %v3143_v2  ;;  %v3144_v48 = vcombine.low %v3143_v2, %v3143_v2  ;;  %v5179_v2 = vld [vmem:[#allocation18_spill] sm:$0xff] }
 0x229   : > { %v3238_v55 = vpop.f32.mrb[7].mxu1  ;;  %v5119_v59 = vmov 0  }
 0x22a   : > { %v1201_v3 = vadd.f32 %v3236_v51, %v4466_v43  ;;  %1379 = vmatprep.mubr.bf16.mxu0 %v5119_v59  ;;  %v4483_v51 = vld [vmem:[%s5050_s6] ss:$0 sm:$0xff]  ;;  %v5182_v59 = vld [vmem:[#allocation29_spill] sm:$0xff] }
 0x22c   : > { %v1241_v57 = vadd.f32 %v1240_v63, %v1201_v3 }
 0x22e   : > { %v1246_v62 = vmax.f32 %v1241_v57, 0.0 }
 0x230   : > { %v1247_v4 = vpack.c.bf16 %v1246_v62, %v1246_v62 }
 0x232   : > { %3432 = vmatmul.mubr.msk.bf16.vlgmr.msra.gmra.mrb[8].mxu1 %vm1162_vm1, %v1247_v4 }
 0x233   : > { %3437 = vmatprep.mubr.msk.bf16.mxu1 %vm3862_vm0, %v5169_v0  ;;  %3436 = vmatpush3.bf16.msra.mxu1 %v4475_v1 }
 0x234   : > { %3248 = vmatprep.subr.bf16.mxu1 %v4057_v13 }
 0x305   : > { %v1303_v4 = vpop.f32.mrb[8].mxu1 }
 0x306   : > { %v1304_v62 = vadd.f32 %v4483_v51, %v1303_v4  ;;  %v3433_v57 = vpop.f32.mrb[9].mxu1  ;;  %v5173_v4 = vld [vmem:[#allocation15_spill] sm:$0xff] }
 0x307   : > { %v1306_v3 = vpop.f32.mrb[10].mxu1  ;;  %v5175_v57 = vld [vmem:[#allocation16_spill] sm:$0xff] }
 0x308   : > { %v1309_v55 = vmax.f32 %v1304_v62, 0.0  ;;  %v3434_v63 = vpop.f32.mrb[11].mxu1  ;;  %v5174_v62 = vld [vmem:[#allocation24_spill] sm:$0xff]  ;;  %v5176_v3 = vld [vmem:[#allocation26_spill] sm:$0xff] }
 0x309   : > { %v5178_v63 = vld [vmem:[#allocation27_spill] sm:$0xff] }
 0x30a   : > { %v1310_v52 = vpack.c.bf16 %v1309_v55, %v1309_v55  ;;  %v5177_v55 = vld [vmem:[#allocation17_spill] sm:$0xff] }
 0x30c   : > { %3141 = vmatmul.mubr.msk.bf16.vlgmr.msra.gmra.mrb[8].mxu0 %vm1343_vm2, %v1310_v52  ;;  %3438 = vmatmul.mubr.msk.bf16.vlgmr.msra.gmra.mrb[12].mxu1 %vm1343_vm2, %v1310_v52  ;;  %v5180_v52 = vld [vmem:[#allocation28_spill] sm:$0xff] }
 0x30d   : > { %1441 = vmatpush1.bf16.msra.mxu0 %v4010_v5  ;;  %3249 = vmatpush3.bf16.msra.mxu1 %v4062_v14 }
 0x30e   : > { %1442 = vmatprep.subr.bf16.mxu0 %v4016_v6  ;;  %3250 = vmatprep.subr.bf16.mxu1 %v4075_v16 }
 0x30f   : > { %1472 = vmatprep.mubr.bf16.mxu0 %v3145_v41  ;;  %1513 = vmatprep.mubr.bf16.mxu1 %v3145_v41  ;;  %v5181_v41 = vld [vmem:[#allocation19_spill] sm:$0xff] }
 0x311   : > { %1443 = vmatpush1.bf16.msra.mxu0 %v4022_v7  ;;  %3251 = vmatpush3.bf16.msra.mxu1 %v4087_v18 }
 0x312   : > { %1444 = vmatprep.subr.bf16.mxu0 %v4028_v8  ;;  %3252 = vmatprep.subr.bf16.mxu1 %v4104_v21 }
 0x315   : > { %1445 = vmatpush1.bf16.msra.mxu0 %v4034_v9  ;;  %3253 = vmatpush3.bf16.msra.mxu1 %v4110_v22 }
 0x316   : > { %1446 = vmatprep.subr.bf16.mxu0 %v4040_v10  ;;  %3254 = vmatprep.subr.bf16.mxu1 %v4121_v24 }
 0x319   : > { %1447 = vmatpush1.bf16.msra.mxu0 %v4046_v11  ;;  %3255 = vmatpush3.bf16.msra.mxu1 %v4128_v25 }
 0x31a   : > { %1448 = vmatprep.subr.bf16.mxu0 %v4052_v12  ;;  %3256 = vmatprep.subr.bf16.mxu1 %v4140_v27 }
 0x31d   : > { %1449 = vmatpush1.bf16.msra.mxu0 %v4067_v15  ;;  %3257 = vmatpush3.bf16.msra.mxu1 %v4152_v29 }
 0x31e   : > { %1450 = vmatprep.subr.bf16.mxu0 %v4081_v17  ;;  %3258 = vmatprep.subr.bf16.mxu1 %v4167_v31 }
 0x321   : > { %1451 = vmatpush1.bf16.msra.mxu0 %v4092_v19  ;;  %3259 = vmatpush3.bf16.msra.mxu1 %v4179_v33 }
 0x322   : > { %1452 = vmatprep.subr.bf16.mxu0 %v4098_v20  ;;  %3260 = vmatprep.subr.bf16.mxu1 %v4192_v35 }
 0x325   : > { %1453 = vmatpush1.bf16.msra.mxu0 %v4116_v23  ;;  %3261 = vmatpush3.bf16.msra.mxu1 %v4209_v38 }
 0x326   : > { %1454 = vmatprep.subr.bf16.mxu0 %v4134_v26  ;;  %3262 = vmatprep.subr.bf16.mxu1 %v4216_v39 }
 0x329   : > { %1455 = vmatpush1.bf16.msra.mxu0 %v4145_v28  ;;  %3263 = vmatpush3.bf16.msra.mxu1 %v4236_v44 }
 0x32a   : > { %1456 = vmatprep.subr.bf16.mxu0 %v4161_v30  ;;  %3270 = vmatprep.subr.bf16.mxu1 %v4243_v45 }
 0x32c   : > { %1514 = vmatmul.mubr.bf16.vlgmr.msra.gmra.mrb[16].mxu1 %v3144_v48 }
 0x32d   : > { %1457 = vmatpush1.bf16.msra.mxu0 %v4172_v32  ;;  %3271 = vmatpush3.bf16.msra.mxu1 %v4260_v49 }
 0x32e   : > { %1458 = vmatprep.subr.bf16.mxu0 %v4186_v34  ;;  %3272 = vmatprep.subr.bf16.mxu1 %v4267_v50 }
 0x331   : > { %1459 = vmatpush1.bf16.msra.mxu0 %v4197_v36  ;;  %3273 = vmatpush3.bf16.msra.mxu1 %v4284_v53 }
 0x332   : > { %1460 = vmatprep.subr.bf16.mxu0 %v4202_v37  ;;  %3274 = vmatprep.subr.bf16.mxu1 %v4291_v54 }
 0x335   : > { %1461 = vmatpush1.bf16.msra.mxu0 %v4221_v40  ;;  %3275 = vmatpush3.bf16.msra.mxu1 %v4301_v56 }
 0x336   : > { %1462 = vmatprep.subr.bf16.mxu0 %v4229_v42  ;;  %3276 = vmatprep.subr.bf16.mxu1 %v4311_v58  ;;  %v5196_v42 = vld [vmem:[#allocation38_spill] sm:$0xff] }
 0x339   : > { %1463 = vmatpush1.bf16.msra.mxu0 %v4248_v46  ;;  %3277 = vmatpush3.bf16.msra.mxu1 %v4325_v60  ;;  %v5183_v60 = vld [vmem:[#allocation21_spill] sm:$0xff] }
 0x33a   : > { %1464 = vmatprep.subr.bf16.mxu0 %v5173_v4  ;;  %3278 = vmatprep.subr.bf16.mxu1 %v5174_v62  ;;  %v5184_v4 = vld [vmem:[#allocation30_spill] sm:$0xff]  ;;  %v5185_v62 = vld [vmem:[#allocation23_spill] sm:$0xff] }
 0x33d   : > { %1465 = vmatpush1.bf16.msra.mxu0 %v5175_v57  ;;  %3279 = vmatpush3.bf16.msra.mxu1 %v5176_v3  ;;  %v5186_v57 = vld [vmem:[#allocation32_spill] sm:$0xff]  ;;  %v5187_v3 = vld [vmem:[#allocation25_spill] sm:$0xff] }
 0x33e   : > { %1466 = vmatprep.subr.bf16.mxu0 %v5177_v55  ;;  %3280 = vmatprep.subr.bf16.mxu1 %v5178_v63  ;;  %v5188_v55 = vld [vmem:[#allocation33_spill] sm:$0xff] }
 0x341   : > { %1467 = vmatpush1.bf16.msra.mxu0 %v5179_v2  ;;  %3281 = vmatpush3.bf16.msra.mxu1 %v5180_v52 }
 0x342   : > { %1468 = vmatprep.subr.bf16.mxu0 %v5181_v41  ;;  %3282 = vmatprep.subr.bf16.mxu1 %v5182_v59  ;;  %v5189_v41 = vld [vmem:[#allocation31_spill] sm:$0xff] }
 0x345   : > { %1469 = vmatpush1.bf16.msra.mxu0 %v5183_v60  ;;  %3283 = vmatpush3.bf16.msra.mxu1 %v5184_v4  ;;  %v5190_v4 = vld [vmem:[#allocation34_spill] sm:$0xff] }
 0x346   : > { %1470 = vmatprep.subr.bf16.mxu0 %v5185_v62  ;;  %3284 = vmatprep.subr.bf16.mxu1 %v5186_v57 }
 0x349   : > { %1471 = vmatpush1.bf16.msra.mxu0 %v5187_v3  ;;  %3285 = vmatpush3.bf16.msra.mxu1 %v5188_v55 }
 0x34a   : > { %3441 = vmatprep.subr.bf16.mxu0 %v5169_v0  ;;  %3449 = vmatprep.subr.bf16.mxu1 %v5169_v0 }
 0x34c   : > { %1473 = vmatmul.mubr.bf16.vlgmr.msra.gmra.mrb[12].mxu0 %v3144_v48 }
 0x34d   : > { %3442 = vmatpush3.bf16.msra.mxu0 %v5189_v41  ;;  %3445 = vmatprep.mubr.msk.bf16.mxu0 %vm3862_vm0, %v5169_v0  ;;  %v5192_v41 = vld [vmem:[#allocation36_spill] sm:$0xff] }
 0x34e   : > { %3443 = vmatprep.subr.bf16.mxu0 %v5169_v0 }
 0x351   : > { %3444 = vmatpush3.bf16.msra.mxu0 %v5190_v4  ;;  %v5193_v4 = vmov 0  }
 0x352   : > { %1660 = vmatprep.subr.bf16.mxu0 %v4453_v47  ;;  %v5194_v47 = vld [vmem:[#allocation12_spill] sm:$0xff] }
 0x3df   : > { %v4559_v57 = vpop.f32.mrb[12].mxu1 }
 0x3e0   : > { %5191 = vst [vmem:[#allocation42_spill] sm:$0xff] %v4559_v57  ;;  %v3439_v3 = vpop.f32.mrb[13].mxu1 }
 0x3e1   : > { %v1425_v55 = vpop.f32.mrb[14].mxu1 }
 0x3e2   : > { %v3440_v62 = vpop.f32.mrb[15].mxu1  ;;  %v5195_v55 = vld [vmem:[#allocation37_spill] sm:$0xff] }
 0x3ff   : > { %v3264_v60 = vpop.f32.mrb[16].mxu1 }
 0x400   : > { %v3265_v59 = vpop.f32.mrb[17].mxu1 }
 0x401   : > { %v3266_v52 = vadd.f32 %v3265_v59, %v3264_v60  ;;  %v3267_v48 = vpop.f32.mrb[18].mxu1 }
 0x402   : > { %v3268_v2 = vpop.f32.mrb[19].mxu1 }
 0x403   : > { %v1516_v63 = vadd.f32 %v3266_v52, %v5192_v41 }
 0x405   : > { %v1523_v46 = vmax.f32 %v1516_v63, 0.0 }
 0x407   : > { %v1526_v58 = vpack.c.bf16 %v1523_v46, %v1523_v46 }
 0x409   : > { %3446 = vmatmul.mubr.msk.bf16.vlgmr.msra.gmra.mrb[16].mxu0 %vm1162_vm1, %v1526_v58  ;;  %v5197_v58 = vld [vmem:[#allocation39_spill] sm:$0xff] }
 0x40a   : > { %1661 = vmatpush1.bf16.msra.mxu0 %v4458_v61  ;;  %1692 = vmatprep.mubr.bf16.mxu0 %v5193_v4 }
 0x40b   : > { %1754 = vmatprep.subr.bf16.mxu0 %v5194_v47  ;;  %v5198_v47 = vld [vmem:[#allocation40_spill] sm:$0xff] }
 0x41f   : > { %v1474_v3 = vpop.f32.mrb[12].mxu0 }
 0x420   : > { %v1475_v62 = vadd.f32 %v1474_v3, %v5195_v55  ;;  %v1476_v57 = vpop.f32.mrb[13].mxu0 }
 0x421   : > { %v1477_v60 = vadd.f32 %v1476_v57, %v5196_v42  ;;  %v1478_v59 = vpop.f32.mrb[14].mxu0 }
 0x422   : > { %v1521_v2 = vmax.f32 %v1475_v62, 0.0  ;;  %v1479_v48 = vpop.f32.mrb[15].mxu0 }
 0x423   : > { %v1522_v52 = vmax.f32 %v1477_v60, 0.0 }
 0x424   : > { %v1524_v46 = vpack.c.bf16 %v1521_v2, %v1521_v2 }
 0x425   : > { %v1525_v63 = vpack.c.bf16 %v1522_v52, %v1522_v52 }
 0x427   : > { %1562 = vmatprep.mubr.bf16.mxu1 %v1525_v63 }
 0x428   : > { %1563 = vmatmul.mubr.bf16.vlgmr.msra.gmra.mrb[20].mxu1 %v1524_v46 }
 0x429   : > { %3450 = vmatpush3.bf16.msra.mxu1 %v5197_v58  ;;  %3453 = vmatprep.mubr.msk.bf16.mxu1 %vm3862_vm0, %v5169_v0 }
 0x42a   : > { %3451 = vmatprep.subr.bf16.mxu1 %v5169_v0 }
 0x42d   : > { %3452 = vmatpush3.bf16.msra.mxu1 %v5198_v47 }
 0x42e   : > { %3457 = vmatprep.subr.bf16.mxu1 %v5169_v0 }
 0x4dc   : > { %v1604_v57 = vpop.f32.mrb[16].mxu0 }
 0x4dd   : > { %v3447_v3 = vpop.f32.mrb[17].mxu0 }
 0x4de   : > { %v1607_v62 = vpop.f32.mrb[18].mxu0 }
 0x4df   : > { %v3448_v59 = vpop.f32.mrb[19].mxu0 }
 0x4fb   : > { %v3286_v60 = vpop.f32.mrb[20].mxu1 }
 0x4fc   : > { %v3287_v48 = vpop.f32.mrb[21].mxu1 }
 0x4fd   : > { %v3288_v2 = vadd.f32 %v3287_v48, %v3286_v60  ;;  %v3289_v52 = vpop.f32.mrb[22].mxu1 }
 0x4fe   : > { %v3290_v63 = vpop.f32.mrb[23].mxu1 }
 0x4ff   : > { %v1565_v46 = vadd.f32 %v3288_v2, %v4466_v43  ;;  %v3150_v2 = vld [vmem:[%s4223_s17 + $0x10] sm:$0xff]  ;;  %v5222_v63 = vld [vmem:[#allocation37_spill] sm:$0xff] }
 0x501   : > { %v1605_v58 = vadd.f32 %v1604_v57, %v1565_v46 }
 0x503   : > { %v1610_v42 = vmax.f32 %v1605_v58, 0.0  ;;  %v3152_v58 = vcombine.high %v3150_v2, %v3150_v2 }
 0x505   : > { %v1611_v55 = vpack.c.bf16 %v1610_v42, %v1610_v42  ;;  %v3759_v42 = vld [vmem:[%s5141_s1 + $0x4] ss:$12 sps:$4 sm:$0xff]  }
 0x507   : > { %3454 = vmatmul.mubr.msk.bf16.vlgmr.msra.gmra.mrb[24].mxu1 %vm1162_vm1, %v1611_v55 }
 0x508   : > { %3458 = vmatpush3.bf16.msra.mxu1 %v4475_v1  ;;  %3459 = vmatprep.mubr.msk.bf16.mxu1 %vm3862_vm0, %v5169_v0 }
 0x509   : > { %3300 = vmatprep.subr.bf16.mxu1 %v4057_v13  ;;  %v5206_v13 = vld [vmem:[#allocation26_spill] sm:$0xff] }
 0x5da   : > { %v1649_v3 = vpop.f32.mrb[24].mxu1 }
 0x5db   : > { %v1650_v62 = vadd.f32 %v4483_v51, %v1649_v3  ;;  %v3455_v59 = vpop.f32.mrb[25].mxu1 }
 0x5dc   : > { %v1652_v60 = vpop.f32.mrb[26].mxu1 }
 0x5dd   : > { %v1655_v48 = vmax.f32 %v1650_v62, 0.0  ;;  %v3456_v52 = vpop.f32.mrb[27].mxu1  ;;  %v5223_v62 = vld [vmem:[#allocation38_spill] sm:$0xff] }
 0x5df   : > { %v1656_v57 = vpack.c.bf16 %v1655_v48, %v1655_v48 }
 0x5e1   : > { %3148 = vmatmul.mubr.msk.bf16.vlgmr.msra.gmra.mrb[20].mxu0 %vm1343_vm2, %v1656_v57  ;;  %3460 = vmatmul.mubr.msk.bf16.vlgmr.msra.gmra.mrb[28].mxu1 %vm1343_vm2, %v1656_v57 }
 0x5e2   : > { %1755 = vmatpush1.bf16.msra.mxu0 %v4010_v5  ;;  %3301 = vmatpush3.bf16.msra.mxu1 %v4062_v14  ;;  %v3151_v5 = vcombine.low %v3150_v2, %v3150_v2  ;;  %v5207_v14 = vld [vmem:[#allocation17_spill] sm:$0xff] }
 0x5e3   : > { %1756 = vmatprep.subr.bf16.mxu0 %v4016_v6  ;;  %3302 = vmatprep.subr.bf16.mxu1 %v4075_v16  ;;  %v5199_v6 = vld [vmem:[#allocation13_spill] sm:$0xff]  ;;  %v5209_v16 = vld [vmem:[#allocation18_spill] sm:$0xff] }
 0x5e4   : > { %1786 = vmatprep.mubr.bf16.mxu0 %v3152_v58  ;;  %1827 = vmatprep.mubr.bf16.mxu1 %v3152_v58 }
 0x5e6   : > { %1757 = vmatpush1.bf16.msra.mxu0 %v4022_v7  ;;  %3303 = vmatpush3.bf16.msra.mxu1 %v4087_v18  ;;  %v5200_v7 = vld [vmem:[#allocation20_spill] sm:$0xff]  ;;  %v5211_v18 = vld [vmem:[#allocation19_spill] sm:$0xff] }
 0x5e7   : > { %1758 = vmatprep.subr.bf16.mxu0 %v4028_v8  ;;  %3304 = vmatprep.subr.bf16.mxu1 %v4104_v21  ;;  %v5201_v8 = vld [vmem:[#allocation14_spill] sm:$0xff] }
 0x5e8   : > { %v5214_v21 = vld [vmem:[#allocation30_spill] sm:$0xff] }
 0x5ea   : > { %1759 = vmatpush1.bf16.msra.mxu0 %v4034_v9  ;;  %3305 = vmatpush3.bf16.msra.mxu1 %v4110_v22  ;;  %v5202_v9 = vld [vmem:[#allocation22_spill] sm:$0xff]  ;;  %v5215_v22 = vld [vmem:[#allocation23_spill] sm:$0xff] }
 0x5eb   : > { %1760 = vmatprep.subr.bf16.mxu0 %v4040_v10  ;;  %3306 = vmatprep.subr.bf16.mxu1 %v4121_v24  ;;  %v5203_v10 = vld [vmem:[#allocation15_spill] sm:$0xff]  ;;  %v5217_v24 = vld [vmem:[#allocation25_spill] sm:$0xff] }
 0x5ee   : > { %1761 = vmatpush1.bf16.msra.mxu0 %v4046_v11  ;;  %3307 = vmatpush3.bf16.msra.mxu1 %v4128_v25  ;;  %v5204_v11 = vld [vmem:[#allocation24_spill] sm:$0xff]  ;;  %v5218_v25 = vld [vmem:[#allocation33_spill] sm:$0xff] }
 0x5ef   : > { %1762 = vmatprep.subr.bf16.mxu0 %v4052_v12  ;;  %3308 = vmatprep.subr.bf16.mxu1 %v4140_v27  ;;  %v5205_v12 = vld [vmem:[#allocation16_spill] sm:$0xff]  ;;  %v5220_v27 = vld [vmem:[#allocation34_spill] sm:$0xff] }
 0x5f2   : > { %1763 = vmatpush1.bf16.msra.mxu0 %v4067_v15  ;;  %3309 = vmatpush3.bf16.msra.mxu1 %v4152_v29  ;;  %v5208_v15 = vld [vmem:[#allocation27_spill] sm:$0xff] }
 0x5f3   : > { %1764 = vmatprep.subr.bf16.mxu0 %v4081_v17  ;;  %3310 = vmatprep.subr.bf16.mxu1 %v4167_v31  ;;  %v5210_v17 = vld [vmem:[#allocation28_spill] sm:$0xff] }
 0x5f6   : > { %1765 = vmatpush1.bf16.msra.mxu0 %v4092_v19  ;;  %3311 = vmatpush3.bf16.msra.mxu1 %v4179_v33  ;;  %v5212_v19 = vld [vmem:[#allocation29_spill] sm:$0xff] }
 0x5f7   : > { %1766 = vmatprep.subr.bf16.mxu0 %v4098_v20  ;;  %3312 = vmatprep.subr.bf16.mxu1 %v4192_v35  ;;  %v5213_v20 = vld [vmem:[#allocation21_spill] sm:$0xff] }
 0x5fa   : > { %1767 = vmatpush1.bf16.msra.mxu0 %v4116_v23  ;;  %3313 = vmatpush3.bf16.msra.mxu1 %v4209_v38  ;;  %v5216_v23 = vld [vmem:[#allocation32_spill] sm:$0xff] }
 0x5fb   : > { %1768 = vmatprep.subr.bf16.mxu0 %v4134_v26  ;;  %3314 = vmatprep.subr.bf16.mxu1 %v4216_v39  ;;  %v5219_v26 = vld [vmem:[#allocation31_spill] sm:$0xff] }
 0x5fe   : > { %1769 = vmatpush1.bf16.msra.mxu0 %v4145_v28  ;;  %3315 = vmatpush3.bf16.msra.mxu1 %v4236_v44  ;;  %v5221_v28 = vld [vmem:[#allocation41_spill] sm:$0xff] }
 0x5ff   : > { %1770 = vmatprep.subr.bf16.mxu0 %v4161_v30  ;;  %3322 = vmatprep.subr.bf16.mxu1 %v4243_v45 }
 0x601   : > { %1828 = vmatmul.mubr.bf16.vlgmr.msra.gmra.mrb[32].mxu1 %v3151_v5 }
 0x602   : > { %1771 = vmatpush1.bf16.msra.mxu0 %v4172_v32  ;;  %3323 = vmatpush3.bf16.msra.mxu1 %v4260_v49 }
 0x603   : > { %1772 = vmatprep.subr.bf16.mxu0 %v4186_v34  ;;  %3324 = vmatprep.subr.bf16.mxu1 %v4267_v50 }
 0x606   : > { %1773 = vmatpush1.bf16.msra.mxu0 %v4197_v36  ;;  %3325 = vmatpush3.bf16.msra.mxu1 %v4284_v53 }
 0x607   : > { %1774 = vmatprep.subr.bf16.mxu0 %v4202_v37  ;;  %3326 = vmatprep.subr.bf16.mxu1 %v4291_v54 }
 0x60a   : > { %1775 = vmatpush1.bf16.msra.mxu0 %v4221_v40  ;;  %3327 = vmatpush3.bf16.msra.mxu1 %v4301_v56 }
 0x60b   : > { %1776 = vmatprep.subr.bf16.mxu0 %v5199_v6  ;;  %3328 = vmatprep.subr.bf16.mxu1 %v5200_v7 }
 0x60e   : > { %1777 = vmatpush1.bf16.msra.mxu0 %v5201_v8  ;;  %3329 = vmatpush3.bf16.msra.mxu1 %v5202_v9 }
 0x60f   : > { %1778 = vmatprep.subr.bf16.mxu0 %v5203_v10  ;;  %3330 = vmatprep.subr.bf16.mxu1 %v5204_v11 }
 0x612   : > { %1779 = vmatpush1.bf16.msra.mxu0 %v5205_v12  ;;  %3331 = vmatpush3.bf16.msra.mxu1 %v5206_v13 }
 0x613   : > { %1780 = vmatprep.subr.bf16.mxu0 %v5207_v14  ;;  %3332 = vmatprep.subr.bf16.mxu1 %v5208_v15 }
 0x616   : > { %1781 = vmatpush1.bf16.msra.mxu0 %v5209_v16  ;;  %3333 = vmatpush3.bf16.msra.mxu1 %v5210_v17 }
 0x617   : > { %1782 = vmatprep.subr.bf16.mxu0 %v5211_v18  ;;  %3334 = vmatprep.subr.bf16.mxu1 %v5212_v19 }
 0x61a   : > { %1783 = vmatpush1.bf16.msra.mxu0 %v5213_v20  ;;  %3335 = vmatpush3.bf16.msra.mxu1 %v5214_v21 }
 0x61b   : > { %1784 = vmatprep.subr.bf16.mxu0 %v5215_v22  ;;  %3336 = vmatprep.subr.bf16.mxu1 %v5216_v23 }
 0x61e   : > { %1785 = vmatpush1.bf16.msra.mxu0 %v5217_v24  ;;  %3337 = vmatpush3.bf16.msra.mxu1 %v5218_v25 }
 0x61f   : > { %3463 = vmatprep.subr.bf16.mxu0 %v5169_v0  ;;  %3471 = vmatprep.subr.bf16.mxu1 %v5169_v0 }
 0x621   : > { %1787 = vmatmul.mubr.bf16.vlgmr.msra.gmra.mrb[24].mxu0 %v3151_v5  ;;  %v5224_v5 = vld [vmem:[#allocation39_spill] sm:$0xff] }
 0x622   : > { %3464 = vmatpush3.bf16.msra.mxu0 %v5219_v26  ;;  %3467 = vmatprep.mubr.msk.bf16.mxu0 %vm3862_vm0, %v5169_v0 }
 0x623   : > { %3465 = vmatprep.subr.bf16.mxu0 %v5169_v0 }
 0x626   : > { %3466 = vmatpush3.bf16.msra.mxu0 %v5220_v27 }
 0x627   : > { %1974 = vmatprep.subr.bf16.mxu0 %v5221_v28 }
 0x6b4   : > { %v4654_v29 = vpop.f32.mrb[28].mxu1 }
 0x6b5   : > { %v3461_v30 = vpop.f32.mrb[29].mxu1 }
 0x6b6   : > { %v1738_v31 = vpop.f32.mrb[30].mxu1 }
 0x6b7   : > { %v3462_v32 = vpop.f32.mrb[31].mxu1 }
 0x6d4   : > { %v3316_v33 = vpop.f32.mrb[32].mxu1 }
 0x6d5   : > { %v3317_v34 = vpop.f32.mrb[33].mxu1 }
 0x6d6   : > { %v3318_v35 = vadd.f32 %v3317_v34, %v3316_v33  ;;  %v3319_v36 = vpop.f32.mrb[34].mxu1 }
 0x6d7   : > { %v3320_v37 = vpop.f32.mrb[35].mxu1 }
 0x6d8   : > { %v1830_v38 = vadd.f32 %v3318_v35, %v5192_v41 }
 0x6da   : > { %v1837_v39 = vmax.f32 %v1830_v38, 0.0 }
 0x6dc   : > { %v1840_v40 = vpack.c.bf16 %v1837_v39, %v1837_v39 }
 0x6de   : > { %3468 = vmatmul.mubr.msk.bf16.vlgmr.msra.gmra.mrb[28].mxu0 %vm1162_vm1, %v1840_v40 }
 0x6df   : > { %1975 = vmatpush1.bf16.msra.mxu0 %v4458_v61  ;;  %2006 = vmatprep.mubr.bf16.mxu0 %v5193_v4 }
 0x6e0   : > { %2068 = vmatprep.subr.bf16.mxu0 %v3759_v42 }
 0x6f4   : > { %v1788_v55 = vpop.f32.mrb[24].mxu0 }
 0x6f5   : > { %v1789_v46 = vadd.f32 %v1788_v55, %v5222_v63  ;;  %v1790_v3 = vpop.f32.mrb[25].mxu0  ;;  %v3760_v55 = vld [vmem:[%s5141_s1 + $0xc8] ss:$12 sps:$4 sm:$0xff]  }
 0x6f6   : > { %v1791_v59 = vadd.f32 %v1790_v3, %v5223_v62  ;;  %v1792_v60 = vpop.f32.mrb[26].mxu0 }
 0x6f7   : > { %v1835_v48 = vmax.f32 %v1789_v46, 0.0  ;;  %v1793_v52 = vpop.f32.mrb[27].mxu0 }
 0x6f8   : > { %v1836_v2 = vmax.f32 %v1791_v59, 0.0 }
 0x6f9   : > { %v1838_v58 = vpack.c.bf16 %v1835_v48, %v1835_v48 }
 0x6fa   : > { %v1839_v57 = vpack.c.bf16 %v1836_v2, %v1836_v2  ;;  %v3157_v2 = vld [vmem:[%s4223_s17 + $0x18] sm:$0xff] }
 0x6fc   : > { %1876 = vmatprep.mubr.bf16.mxu1 %v1839_v57 }
 0x6fd   : > { %1877 = vmatmul.mubr.bf16.vlgmr.msra.gmra.mrb[36].mxu1 %v1838_v58  ;;  %v3159_v58 = vcombine.high %v3157_v2, %v3157_v2 }
 0x6fe   : > { %3472 = vmatpush3.bf16.msra.mxu1 %v5224_v5  ;;  %3475 = vmatprep.mubr.msk.bf16.mxu1 %vm3862_vm0, %v5169_v0 }
 0x6ff   : > { %3473 = vmatprep.subr.bf16.mxu1 %v5169_v0 }
 0x702   : > { %3474 = vmatpush3.bf16.msra.mxu1 %v5198_v47 }
 0x703   : > { %3479 = vmatprep.subr.bf16.mxu1 %v5169_v0 }
 0x7b1   : > { %v1918_v6 = vpop.f32.mrb[28].mxu0 }
 0x7b2   : > { %v3469_v30 = vpop.f32.mrb[29].mxu0 }
 0x7b3   : > { %v1921_v31 = vpop.f32.mrb[30].mxu0  ;;  %v3762_v30 = vld [vmem:[%s5141_s1 + $0x8] ss:$12 sps:$4 sm:$0xff]  }
 0x7b4   : > { %v3470_v32 = vpop.f32.mrb[31].mxu0  ;;  %v3763_v31 = vld [vmem:[%s5141_s1 + $0x1c] ss:$12 sps:$4 sm:$0xff]  }
 0x7b5   : > { %v3764_v32 = vld [vmem:[%s5141_s1 + $0xe0] ss:$12 sps:$4 sm:$0xff]  }
 0x7d0   : > { %v3338_v33 = vpop.f32.mrb[36].mxu1 }
 0x7d1   : > { %v3339_v34 = vpop.f32.mrb[37].mxu1 }
 0x7d2   : > { %v3340_v35 = vadd.f32 %v3339_v34, %v3338_v33  ;;  %v3341_v36 = vpop.f32.mrb[38].mxu1  ;;  %v3765_v33 = vld [vmem:[%s5141_s1 + $0x18] ss:$12 sps:$4 sm:$0xff]   ;;  %v3766_v34 = vld [vmem:[%s5141_s1 + $0x20] ss:$12 sps:$4 sm:$0xff]  }
 0x7d3   : > { %v3342_v37 = vpop.f32.mrb[39].mxu1  ;;  %v3768_v36 = vld [vmem:[%s5141_s1 + $0xf8] ss:$12 sps:$4 sm:$0xff]  }
 0x7d4   : > { %v1879_v38 = vadd.f32 %v3340_v35, %v4466_v43  ;;  %v3767_v35 = vld [vmem:[%s5141_s1 + $0x34] ss:$12 sps:$4 sm:$0xff]   ;;  %v3769_v37 = vld [vmem:[%s5141_s1 + $0x30] ss:$12 sps:$4 sm:$0xff]  }
 0x7d6   : > { %v1919_v39 = vadd.f32 %v1918_v6, %v1879_v38  ;;  %v3761_v6 = vld [vmem:[%s5141_s1] ss:$12 sps:$4 sm:$0xff]   ;;  %v3770_v38 = vld [vmem:[%s5141_s1 + $0x38] ss:$12 sps:$4 sm:$0xff]  }
 0x7d8   : > { %v1924_v40 = vmax.f32 %v1919_v39, 0.0  ;;  %v3771_v39 = vld [vmem:[%s5141_s1 + $0x4c] ss:$12 sps:$4 sm:$0xff]  }
 0x7da   : > { %v1925_v42 = vpack.c.bf16 %v1924_v40, %v1924_v40  ;;  %v3772_v40 = vld [vmem:[%s5141_s1 + $0x110] ss:$12 sps:$4 sm:$0xff]  }
 0x7dc   : > { %3476 = vmatmul.mubr.msk.bf16.vlgmr.msra.gmra.mrb[40].mxu1 %vm1162_vm1, %v1925_v42  ;;  %v3773_v42 = vld [vmem:[%s5141_s1 + $0x48] ss:$12 sps:$4 sm:$0xff]  }
 0x7dd   : > { %3480 = vmatpush3.bf16.msra.mxu1 %v4475_v1  ;;  %3481 = vmatprep.mubr.msk.bf16.mxu1 %vm3862_vm0, %v5169_v0 }
 0x7de   : > { %3352 = vmatprep.subr.bf16.mxu1 %v3760_v55  ;;  %v3774_v55 = vld [vmem:[%s5141_s1 + $0x50] ss:$12 sps:$4 sm:$0xff]  }
 0x8af   : > { %v1963_v46 = vpop.f32.mrb[40].mxu1 }
 0x8b0   : > { %v1964_v3 = vadd.f32 %v4483_v51, %v1963_v46  ;;  %v3477_v59 = vpop.f32.mrb[41].mxu1  ;;  %v3775_v46 = vld [vmem:[%s5141_s1 + $0x64] ss:$12 sps:$4 sm:$0xff]  }
 0x8b1   : > { %v1966_v60 = vpop.f32.mrb[42].mxu1  ;;  %v3777_v59 = vld [vmem:[%s5141_s1 + $0x60] ss:$12 sps:$4 sm:$0xff]  }
 0x8b2   : > { %v1969_v48 = vmax.f32 %v1964_v3, 0.0  ;;  %v3478_v52 = vpop.f32.mrb[43].mxu1  ;;  %v3776_v3 = vld [vmem:[%s5141_s1 + $0x128] ss:$12 sps:$4 sm:$0xff]  }
 0x8b3   : > { %v3778_v60 = vld [vmem:[%s5141_s1 + $0x68] ss:$12 sps:$4 sm:$0xff]   ;;  %v3780_v52 = vld [vmem:[%s5141_s1 + $0x140] ss:$12 sps:$4 sm:$0xff]  }
 0x8b4   : > { %v1970_v57 = vpack.c.bf16 %v1969_v48, %v1969_v48  ;;  %v3779_v48 = vld [vmem:[%s5141_s1 + $0x7c] ss:$12 sps:$4 sm:$0xff]  }
 0x8b6   : > { %3155 = vmatmul.mubr.msk.bf16.vlgmr.msra.gmra.mrb[32].mxu0 %vm1343_vm2, %v1970_v57  ;;  %3482 = vmatmul.mubr.msk.bf16.vlgmr.msra.gmra.mrb[44].mxu1 %vm1343_vm2, %v1970_v57  ;;  %v3781_v57 = vld [vmem:[%s5141_s1 + $0x78] ss:$12 sps:$4 sm:$0xff]  }
 0x8b7   : > { %2069 = vmatpush1.bf16.msra.mxu0 %v3761_v6  ;;  %3353 = vmatpush3.bf16.msra.mxu1 %v3762_v30  ;;  %v3783_v6 = vld [vmem:[%s5141_s1 + $0x94] ss:$12 sps:$4 sm:$0xff]   ;;  %v3784_v30 = vld [vmem:[%s5141_s1 + $0x158] ss:$12 sps:$4 sm:$0xff]  }
 0x8b8   : > { %2070 = vmatprep.subr.bf16.mxu0 %v3763_v31  ;;  %3354 = vmatprep.subr.bf16.mxu1 %v3764_v32  ;;  %v3785_v31 = vld [vmem:[%s5141_s1 + $0x90] ss:$12 sps:$4 sm:$0xff]   ;;  %v3786_v32 = vld [vmem:[%s5141_s1 + $0x98] ss:$12 sps:$4 sm:$0xff]  }
 0x8b9   : > { %2100 = vmatprep.mubr.bf16.mxu0 %v3159_v58  ;;  %2141 = vmatprep.mubr.bf16.mxu1 %v3159_v58  ;;  %v3782_v58 = vld [vmem:[%s5141_s1 + $0x80] ss:$12 sps:$4 sm:$0xff]  }
 0x8bb   : > { %2071 = vmatpush1.bf16.msra.mxu0 %v3765_v33  ;;  %3355 = vmatpush3.bf16.msra.mxu1 %v3766_v34  ;;  %v3787_v33 = vld [vmem:[%s5141_s1 + $0xac] ss:$12 sps:$4 sm:$0xff]   ;;  %v3788_v34 = vld [vmem:[%s5141_s1 + $0x170] ss:$12 sps:$4 sm:$0xff]  }
 0x8bc   : > { %2072 = vmatprep.subr.bf16.mxu0 %v3767_v35  ;;  %3356 = vmatprep.subr.bf16.mxu1 %v3768_v36  ;;  %v3158_v35 = vcombine.low %v3157_v2, %v3157_v2  ;;  %v3789_v36 = vld [vmem:[%s5141_s1 + $0xa8] ss:$12 sps:$4 sm:$0xff]  }
 0x8bd   : > { %v3792_v2 = vld [vmem:[%s5141_s1 + $0xdc] ss:$12 sps:$4 sm:$0xff]  }
 0x8bf   : > { %2073 = vmatpush1.bf16.msra.mxu0 %v3769_v37  ;;  %3357 = vmatpush3.bf16.msra.mxu1 %v3770_v38  ;;  %v3790_v37 = vld [vmem:[%s5141_s1 + $0xc4] ss:$12 sps:$4 sm:$0xff]   ;;  %v3791_v38 = vld [vmem:[%s5141_s1 + $0xc0] ss:$12 sps:$4 sm:$0xff]  }
 0x8c0   : > { %2074 = vmatprep.subr.bf16.mxu0 %v3771_v39  ;;  %3358 = vmatprep.subr.bf16.mxu1 %v3772_v40 }
 0x8c3   : > { %2075 = vmatpush1.bf16.msra.mxu0 %v3773_v42  ;;  %3359 = vmatpush3.bf16.msra.mxu1 %v3774_v55 }
 0x8c4   : > { %2076 = vmatprep.subr.bf16.mxu0 %v3775_v46  ;;  %3360 = vmatprep.subr.bf16.mxu1 %v3776_v3 }
 0x8c7   : > { %2077 = vmatpush1.bf16.msra.mxu0 %v3777_v59  ;;  %3361 = vmatpush3.bf16.msra.mxu1 %v3778_v60 }
 0x8c8   : > { %2078 = vmatprep.subr.bf16.mxu0 %v3779_v48  ;;  %3362 = vmatprep.subr.bf16.mxu1 %v3780_v52  ;;  %v4860_v52 = vld [vmem:[%s5053_s9] ss:$12 sps:$4 sm:$0xff]  }
 0x8cb   : > { %2079 = vmatpush1.bf16.msra.mxu0 %v3781_v57  ;;  %3363 = vmatpush3.bf16.msra.mxu1 %v3782_v58  ;;  %v4865_v58 = vld [vmem:[%s5053_s9 + $0x1c] ss:$12 sps:$4 sm:$0xff]  }
 0x8cc   : > { %2080 = vmatprep.subr.bf16.mxu0 %v3783_v6  ;;  %3364 = vmatprep.subr.bf16.mxu1 %v3784_v30  ;;  %v4883_v6 = vld [vmem:[%s5053_s9 + $0x18] ss:$12 sps:$4 sm:$0xff]  }
 0x8cd   : > { %v2382_v30 = vld [vmem:[%s563_s16] sm:$0xff]  ;;  %s2952_s16 = sshll.u32 %s559_s20, 4  ;;  %s2953_s16 = int_to_ptr.vmem [resolvable:$true] %s2952_s16 }
 0x8ce   : > { %s3797_s19 = scalar_lea.vmem %s2953_s16, 128  ;;  %p3804_p3 = scmp.lt.s32.totalorder %s2953_s16, %s3802_s26 }
 0x8cf   : > { %2081 = vmatpush1.bf16.msra.mxu0 %v3785_v31  ;;  %3365 = vmatpush3.bf16.msra.mxu1 %v3786_v32  ;;  %v4891_v31 = vld [vmem:[%s5053_s9 + $0x20] ss:$12 sps:$4 sm:$0xff]   ;;  %v2386_v32 = vpack.c.bf16 %v2382_v30, %v2382_v30  ;;  %p3798_p0 = scmp.ne.s32.totalorder %s2953_s16, %s3797_s19 }
 0x8d0   : > { %2082 = vmatprep.subr.bf16.mxu0 %v3787_v33  ;;  %3366 = vmatprep.subr.bf16.mxu1 %v3788_v34 }
 0x8d1   : > { %p3799_p1 = pnand %p3798_p0, %p3984_p6 }
 0x8d3   : > { %2083 = vmatpush1.bf16.msra.mxu0 %v3789_v36  ;;  %3367 = vmatpush3.bf16.msra.mxu1 %v4236_v44  ;;  %v3793_v44 = vld [vmem:[%s5141_s1 + $0xd8] ss:$12 sps:$4 sm:$0xff]   ;;  %p3800_p2 = pneg %p3799_p1 }
 0x8d4   : > { %2084 = vmatprep.subr.bf16.mxu0 %v3790_v37  ;;  %3374 = vmatprep.subr.bf16.mxu1 %v4243_v45  ;;  %v3794_v45 = vld [vmem:[%s5141_s1 + $0xf4] ss:$12 sps:$4 sm:$0xff]  }
 0x8d5   : > { %v680_v37 = vld [vmem:[%s5052_s8] sm:$0x7] }
 0x8d6   : > { %2142 = vmatmul.mubr.bf16.vlgmr.msra.gmra.mrb[48].mxu1 %v3158_v35 }
 0x8d7   : > { %2085 = vmatpush1.bf16.msra.mxu0 %v3791_v38  ;;  %3375 = vmatpush3.bf16.msra.mxu1 %v4260_v49  ;;  %v3795_v49 = vld [vmem:[%s5141_s1 + $0xf0] ss:$12 sps:$4 sm:$0xff]   ;;  %v5225_v38 = vld [vmem:[#allocation35_spill] sm:$0xff] }
 0x8d8   : > { %2086 = vmatprep.subr.bf16.mxu0 %v3792_v2  ;;  %3376 = vmatprep.subr.bf16.mxu1 %v4267_v50  ;;  %v3796_v50 = vld [vmem:[%s5141_s1 + $0x10c] ss:$12 sps:$4 sm:$0xff]   ;;  %v5226_v2 = vsub.s32 0, %v5225_v38  ;;  %s3803_s1 = scalar_lea.vmem %s3802_s26, 256 }
 0x8d9   : > { %p3805_p4 = scmp.lt.s32.totalorder %s3803_s1, %s3797_s19 }
 0x8db   : > { %2087 = vmatpush1.bf16.msra.mxu0 %v3793_v44  ;;  %3377 = vmatpush3.bf16.msra.mxu1 %v4284_v53  ;;  %v4920_v44 = vrot.slane %v680_v37, %v5226_v2  ;;  %p3806_p5 = por %p3805_p4, %p3804_p3 }
 0x8dc   : > { %2088 = vmatprep.subr.bf16.mxu0 %v3794_v45  ;;  %3378 = vmatprep.subr.bf16.mxu1 %v4291_v54 }
 0x8dd   : > { %p3807_p7 = pnand %p3806_p5, %p3800_p2 }
 0x8df   : > { %2089 = vmatpush1.bf16.msra.mxu0 %v3795_v49  ;;  %3379 = vmatpush3.bf16.msra.mxu1 %v4301_v56  ;;  %v5227_v49 = vsub.s32 1, %v5225_v38 }
 0x8e0   : > { %2090 = vmatprep.subr.bf16.mxu0 %v3796_v50  ;;  %3380 = vmatprep.subr.bf16.mxu1 %v5200_v7 }
 0x8e1   : > { %v4924_v50 = vrot.slane %v680_v37, %v5227_v49 }
 0x8e3   : > { %2091 = vmatpush1.bf16.msra.mxu0 %v5201_v8  ;;  %3381 = vmatpush3.bf16.msra.mxu1 %v5202_v9 }
 0x8e4   : > { %2092 = vmatprep.subr.bf16.mxu0 %v5203_v10  ;;  %3382 = vmatprep.subr.bf16.mxu1 %v5204_v11 }
 0x8e7   : > { %2093 = vmatpush1.bf16.msra.mxu0 %v5205_v12  ;;  %3383 = vmatpush3.bf16.msra.mxu1 %v5206_v13 }
 0x8e8   : > { %2094 = vmatprep.subr.bf16.mxu0 %v5207_v14  ;;  %3384 = vmatprep.subr.bf16.mxu1 %v5208_v15 }
 0x8eb   : > { %2095 = vmatpush1.bf16.msra.mxu0 %v5209_v16  ;;  %3385 = vmatpush3.bf16.msra.mxu1 %v5210_v17 }
 0x8ec   : > { %2096 = vmatprep.subr.bf16.mxu0 %v5211_v18  ;;  %3386 = vmatprep.subr.bf16.mxu1 %v5212_v19 }
 0x8ef   : > { %2097 = vmatpush1.bf16.msra.mxu0 %v5213_v20  ;;  %3387 = vmatpush3.bf16.msra.mxu1 %v5214_v21 }
 0x8f0   : > { %2098 = vmatprep.subr.bf16.mxu0 %v5215_v22  ;;  %3388 = vmatprep.subr.bf16.mxu1 %v5216_v23 }
 0x8f3   : > { %2099 = vmatpush1.bf16.msra.mxu0 %v5217_v24  ;;  %3389 = vmatpush3.bf16.msra.mxu1 %v5218_v25 }
 0x8f4   : > { %3485 = vmatprep.subr.bf16.mxu0 %v5169_v0  ;;  %3493 = vmatprep.subr.bf16.mxu1 %v5169_v0 }
 0x8f6   : > { %2101 = vmatmul.mubr.bf16.vlgmr.msra.gmra.mrb[36].mxu0 %v3158_v35 }
 0x8f7   : > { %3486 = vmatpush3.bf16.msra.mxu0 %v5219_v26  ;;  %3489 = vmatprep.mubr.msk.bf16.mxu0 %vm3862_vm0, %v5169_v0 }
 0x8f8   : > { %3487 = vmatprep.subr.bf16.mxu0 %v5169_v0 }
 0x8fb   : > { %3488 = vmatpush3.bf16.msra.mxu0 %v5220_v27 }
 0x8fc   : > { %2288 = vmatprep.subr.bf16.mxu0 %v5221_v28 }
 0x989   : > { %v4825_v53 = vpop.f32.mrb[44].mxu1 }
 0x98a   : > { %v3483_v54 = vpop.f32.mrb[45].mxu1 }
 0x98b   : > { %v2052_v56 = vpop.f32.mrb[46].mxu1 }
 0x98c   : > { %v3484_v7 = vpop.f32.mrb[47].mxu1 }
 0x9a9   : > { %v3368_v8 = vpop.f32.mrb[48].mxu1 }
 0x9aa   : > { %v3369_v9 = vpop.f32.mrb[49].mxu1 }
 0x9ab   : > { %v3370_v10 = vadd.f32 %v3369_v9, %v3368_v8  ;;  %v3371_v11 = vpop.f32.mrb[50].mxu1 }
 0x9ac   : > { %v3372_v12 = vpop.f32.mrb[51].mxu1 }
 0x9ad   : > { %v2144_v13 = vadd.f32 %v3370_v10, %v5192_v41 }
 0x9af   : > { %v2151_v14 = vmax.f32 %v2144_v13, 0.0 }
 0x9b1   : > { %v2154_v15 = vpack.c.bf16 %v2151_v14, %v2151_v14 }
 0x9b3   : > { %3490 = vmatmul.mubr.msk.bf16.vlgmr.msra.gmra.mrb[40].mxu0 %vm1162_vm1, %v2154_v15 }
 0x9b4   : > { %2289 = vmatpush1.bf16.msra.mxu0 %v4458_v61  ;;  %2320 = vmatprep.mubr.bf16.mxu0 %v5193_v4 }
 0x9c9   : > { %v2102_v16 = vpop.f32.mrb[36].mxu0 }
 0x9ca   : > { %v2103_v17 = vadd.f32 %v2102_v16, %v5222_v63  ;;  %v2104_v18 = vpop.f32.mrb[37].mxu0 }
 0x9cb   : > { %v2105_v19 = vadd.f32 %v2104_v18, %v5223_v62  ;;  %v2106_v20 = vpop.f32.mrb[38].mxu0 }
 0x9cc   : > { %v2149_v21 = vmax.f32 %v2103_v17, 0.0  ;;  %v2107_v22 = vpop.f32.mrb[39].mxu0  ;;  %v5228_v20 = vsub.s32 2, %v5225_v38 }
 0x9cd   : > { %v2150_v23 = vmax.f32 %v2105_v19, 0.0  ;;  %v4931_v19 = vld [vmem:[%s5054_s10] ss:$0 sm:$0xff] }
 0x9ce   : > { %v2152_v41 = vpack.c.bf16 %v2149_v21, %v2149_v21  ;;  %v4935_v21 = vrot.slane %v680_v37, %v5228_v20 }
 0x9cf   : > { %v2153_v24 = vpack.c.bf16 %v2150_v23, %v2150_v23 }
 0x9d0   : > { %v1736_v2 = vadd.f32 %v4654_v29, %v4935_v21 }
 0x9d1   : > { %2190 = vmatprep.mubr.bf16.mxu1 %v2153_v24 }
 0x9d2   : > { %2191 = vmatmul.mubr.bf16.vlgmr.msra.gmra.mrb[52].mxu1 %v2152_v41  ;;  %v5229_v41 = vld [vmem:[#allocation42_spill] sm:$0xff] }
 0x9d3   : > { %3494 = vmatpush3.bf16.msra.mxu1 %v5224_v5  ;;  %3497 = vmatprep.mubr.msk.bf16.mxu1 %vm3862_vm0, %v5169_v0 }
 0x9d4   : > { %3495 = vmatprep.subr.bf16.mxu1 %v5169_v0 }
 0x9d7   : > { %3496 = vmatpush3.bf16.msra.mxu1 %v5198_v47  ;;  %v4848_v47 = vld [vmem:[%s5053_s9 + $0x4] ss:$12 sps:$4 sm:$0xff]  }
 0x9d8   : > { %3501 = vmatprep.subr.bf16.mxu1 %v5169_v0  ;;  %2422 = vmatprep.subr.bf16.mxu0 %v4848_v47 }
 0xa86   : > { %v2232_v61 = vpop.f32.mrb[40].mxu0 }
 0xa87   : > { %v3491_v25 = vpop.f32.mrb[41].mxu0 }
 0xa88   : > { %v2235_v26 = vpop.f32.mrb[42].mxu0 }
 0xa89   : > { %v3492_v27 = vpop.f32.mrb[43].mxu0 }
 0xaa5   : > { %v3390_v28 = vpop.f32.mrb[52].mxu1 }
 0xaa6   : > { %v3391_v63 = vpop.f32.mrb[53].mxu1 }
 0xaa7   : > { %v3392_v62 = vadd.f32 %v3391_v63, %v3390_v28  ;;  %v3393_v39 = vpop.f32.mrb[54].mxu1 }
 0xaa8   : > { %v3394_v5 = vpop.f32.mrb[55].mxu1 }
 0xaa9   : > { %v2193_v40 = vadd.f32 %v3392_v62, %v4466_v43 }
 0xaab   : > { %v2233_v42 = vadd.f32 %v2232_v61, %v2193_v40  ;;  %v1423_v61 = vadd.f32 %v5229_v41, %v4935_v21  ;;  %v2050_v41 = vadd.f32 %v4825_v53, %v4935_v21  ;;  %v3717_v53 = vld [vmem:[%s5055_s11] sm:$0xff]  }
 0xaad   : > { %v2238_v55 = vmax.f32 %v2233_v42, 0.0 }
 0xaaf   : > { %v2239_v46 = vpack.c.bf16 %v2238_v55, %v2238_v55 }
 0xab1   : > { %3498 = vmatmul.mubr.msk.bf16.vlgmr.msra.gmra.mrb[56].mxu1 %vm1162_vm1, %v2239_v46 }
 0xab2   : > { %3502 = vmatpush3.bf16.msra.mxu1 %v4475_v1  ;;  %3503 = vmatprep.mubr.msk.bf16.mxu1 %vm3862_vm0, %v5169_v0 }
 0xab3   : > { %3507 = vmatprep.subr.bf16.mxu1 %v5169_v0 }
 0xb84   : > { %v2277_v43 = vpop.f32.mrb[56].mxu1 }
 0xb85   : > { %v2278_v1 = vadd.f32 %v4483_v51, %v2277_v43  ;;  %v3499_v3 = vpop.f32.mrb[57].mxu1  ;;  %v4875_v51 = vld [vmem:[%s5053_s9 + $0x8] ss:$12 sps:$4 sm:$0xff]  }
 0xb86   : > { %v2280_v59 = vpop.f32.mrb[58].mxu1 }
 0xb87   : > { %v2283_v60 = vmax.f32 %v2278_v1, 0.0  ;;  %v3500_v48 = vpop.f32.mrb[59].mxu1 }
 0xb89   : > { %v2284_v57 = vpack.c.bf16 %v2283_v60, %v2283_v60 }
 0xb8b   : > { %3162 = vmatmul.mubr.msk.bf16.vlgmr.msra.gmra.mrb[44].mxu0 %vm1343_vm2, %v2284_v57  ;;  %3504 = vmatmul.mubr.msk.bf16.vlgmr.msra.gmra.mrb[60].mxu1 %vm1343_vm2, %v2284_v57 }
 0xb8c   : > { %2423 = vmatpush1.bf16.msra.mxu0 %v4860_v52  ;;  %2454 = vmatprep.mubr.bf16.mxu0 %v5193_v4 }
 0xb8d   : > { %2424 = vmatprep.subr.bf16.mxu0 %v4865_v58  ;;  %3508 = vmatpush3.bf16.msra.mxu1 %v4875_v51 }
 0xb8e   : > { %3509 = vmatprep.subr.bf16.mxu1 %v5169_v0  ;;  %3511 = vmatprep.mubr.msk.bf16.mxu1 %vm3862_vm0, %v5169_v0 }
 0xb90   : > { %2425 = vmatpush1.bf16.msra.mxu0 %v4883_v6 }
 0xb91   : > { %3510 = vmatpush3.bf16.msra.mxu1 %v4891_v31  ;;  %2538 = vmatprep.subr.bf16.mxu0 %v4848_v47 }
 0xb92   : > { %3515 = vmatprep.subr.bf16.mxu1 %v5169_v0 }
 0xb93   : > { %3170 = vmatmul.mubr.msk.bf16.vlgmr.msra.gmra.mrb[8].mxu0 %vm1162_vm1, %v2386_v32 }
 0xb94   : > { %3512 = vmatmul.mubr.msk.bf16.vlgmr.msra.gmra.mrb[64].mxu1 %vm1162_vm1, %v2386_v32  ;;  %2539 = vmatpush1.bf16.msra.mxu0 %v4860_v52 }
 0xb95   : > { %3516 = vmatpush3.bf16.msra.mxu1 %v4875_v51  ;;  %2540 = vmatprep.subr.bf16.mxu0 %v4865_v58 }
 0xb96   : > { %3517 = vmatprep.subr.bf16.mxu1 %v5169_v0  ;;  %2570 = vmatprep.mubr.bf16.mxu0 %v5193_v4 }
 0xb97   : > { %3519 = vmatprep.mubr.msk.bf16.mxu1 %vm3862_vm0, %v5169_v0 }
 0xb98   : > { %2541 = vmatpush1.bf16.msra.mxu0 %v4883_v6 }
 0xb99   : > { %3518 = vmatpush3.bf16.msra.mxu1 %v4891_v31  ;;  %2648 = vmatprep.subr.bf16.mxu0 %v4848_v47 }
 0xb9a   : > { %3523 = vmatprep.subr.bf16.mxu1 %v5169_v0 }
 0xc5e   : > { %v4913_v33 = vpop.f32.mrb[60].mxu1 }
 0xc5f   : > { %v3505_v34 = vpop.f32.mrb[61].mxu1 }
 0xc60   : > { %v2366_v35 = vpop.f32.mrb[62].mxu1 }
 0xc61   : > { %v3506_v36 = vpop.f32.mrb[63].mxu1 }
 0xc66   : > { %v2456_v45 = vpop.f32.mrb[8].mxu0 }
 0xc67   : > { %v3547_v54 = vadd.f32 %v2456_v45, %v4920_v44  ;;  %v2458_v56 = vpop.f32.mrb[9].mxu0  ;;  %v2497_v7 = vpop.f32.mrb[64].mxu1 }
 0xc68   : > { %v2460_v8 = vpop.f32.mrb[10].mxu0  ;;  %v3513_v9 = vpop.f32.mrb[65].mxu1  ;;  %v3548_v13 = vadd.f32 %v2458_v56, %v4924_v50  ;;  %v2523_v23 = vadd.f32 %v4931_v19, %v2497_v7 }
 0xc69   : > { %v3172_v10 = vmul.f32 -1.442695, %v3547_v54  ;;  %v2461_v11 = vpop.f32.mrb[11].mxu0  ;;  %v2500_v12 = vpop.f32.mrb[66].mxu1 }
 0xc6a   : > { %v3514_v14 = vpop.f32.mrb[67].mxu1  ;;  %v3173_v15 = vmul.f32 -1.442695, %v3548_v13 }
 0xc6b   : > { %3719 = vpow2.f32 %v3172_v10 }
 0xc6c   : > { %3721 = vpow2.f32 %v3173_v15 }
 0xc75   : > { %v3720_v16 = vpop.eup %3719 }
 0xc76   : > { %v2507_v17 = vadd.f32 1.0, %v3720_v16  ;;  %v3722_v18 = vpop.eup %3721 }
 0xc77   : > { %v2514_v22 = vadd.f32 1.0, %v3722_v18 }
 0xc78   : > { %3723 = vrcp.f32 %v2507_v17 }
 0xc79   : > { %3725 = vrcp.f32 %v2514_v22 }
 0xc82   : > { %v3724_v24 = vpop.eup %3723 }
 0xc83   : > { %v2524_v25 = vmul.f32 %v3724_v24, %v2523_v23  ;;  %v3726_v27 = vpop.eup %3725 }
 0xc84   : > { %v2527_v28 = vsub.f32 1.0, %v3726_v27  ;;  %v2529_v62 = vmul.f32 %v3726_v27, %v2382_v30 }
 0xc85   : > { %v2525_v26 = vadd.f32 %v2524_v25, %v1423_v61 }
 0xc87   : > { %3727 = vtanh.f32 %v2525_v26 }
 0xc91   : > { %v3728_v63 = vpop.eup %3727 }
 0xc92   : > { %v2528_v39 = vmul.f32 %v3728_v63, %v2527_v28 }
 0xc94   : > { %v2530_v5 = vadd.f32 %v2529_v62, %v2528_v39 }
 0xc96   : > { %v2534_v40 = vpack.c.bf16 %v2530_v5, %v2530_v5 }
 0xc98   : > { %3175 = vmatmul.mubr.msk.bf16.vlgmr.msra.gmra.mrb[20].mxu0 %vm1162_vm1, %v2534_v40  ;;  %3520 = vmatmul.mubr.msk.bf16.vlgmr.msra.gmra.mrb[68].mxu1 %vm1162_vm1, %v2534_v40  ;;  %v3718_v40 = vld [vmem:[%s5055_s11 + $0x8] sm:$0xff]  }
 0xc99   : > { %2649 = vmatpush1.bf16.msra.mxu0 %v4860_v52  ;;  %3524 = vmatpush3.bf16.msra.mxu1 %v4875_v51 }
 0xc9a   : > { %2650 = vmatprep.subr.bf16.mxu0 %v4865_v58  ;;  %3525 = vmatprep.subr.bf16.mxu1 %v5169_v0 }
 0xc9b   : > { %2680 = vmatprep.mubr.bf16.mxu0 %v5193_v4  ;;  %3527 = vmatprep.mubr.msk.bf16.mxu1 %vm3862_vm0, %v5169_v0 }
 0xc9d   : > { %2651 = vmatpush1.bf16.msra.mxu0 %v4883_v6  ;;  %3526 = vmatpush3.bf16.msra.mxu1 %v4891_v31 }
 0xc9e   : > { %2758 = vmatprep.subr.bf16.mxu0 %v4848_v47  ;;  %3531 = vmatprep.subr.bf16.mxu1 %v5169_v0 }
 0xd6b   : > { %v2572_v42 = vpop.f32.mrb[20].mxu0  ;;  %v2613_v55 = vpop.f32.mrb[68].mxu1 }
 0xd6c   : > { %v3549_v46 = vadd.f32 %v2572_v42, %v4920_v44  ;;  %v2574_v43 = vpop.f32.mrb[21].mxu0  ;;  %v3521_v1 = vpop.f32.mrb[69].mxu1  ;;  %v2633_v37 = vadd.f32 %v4931_v19, %v2613_v55 }
 0xd6d   : > { %v2576_v3 = vpop.f32.mrb[22].mxu0  ;;  %v2616_v59 = vpop.f32.mrb[70].mxu1  ;;  %v3550_v30 = vadd.f32 %v2574_v43, %v4924_v50 }
 0xd6e   : > { %v3177_v60 = vmul.f32 -1.442695, %v3549_v46  ;;  %v2577_v48 = vpop.f32.mrb[23].mxu0  ;;  %v3522_v57 = vpop.f32.mrb[71].mxu1 }
 0xd6f   : > { %v3178_v32 = vmul.f32 -1.442695, %v3550_v30 }
 0xd70   : > { %3729 = vpow2.f32 %v3177_v60 }
 0xd71   : > { %3731 = vpow2.f32 %v3178_v32 }
 0xd7a   : > { %v3730_v34 = vpop.eup %3729 }
 0xd7b   : > { %v2623_v47 = vadd.f32 1.0, %v3730_v34  ;;  %v3732_v35 = vpop.eup %3731 }
 0xd7c   : > { %v2630_v36 = vadd.f32 1.0, %v3732_v35 }
 0xd7d   : > { %3733 = vrcp.f32 %v2623_v47 }
 0xd7e   : > { %3735 = vrcp.f32 %v2630_v36 }
 0xd87   : > { %v3734_v38 = vpop.eup %3733 }
 0xd88   : > { %v2634_v45 = vmul.f32 %v3734_v38, %v2633_v37  ;;  %v3736_v54 = vpop.eup %3735  ;;  %v2364_v37 = vadd.f32 %v4913_v33, %v4935_v21 }
 0xd89   : > { %v2637_v56 = vsub.f32 1.0, %v3736_v54  ;;  %v2639_v8 = vmul.f32 %v3736_v54, %v2530_v5 }
 0xd8a   : > { %v2635_v49 = vadd.f32 %v2634_v45, %v1736_v2 }
 0xd8c   : > { %3737 = vtanh.f32 %v2635_v49 }
 0xd96   : > { %v3738_v7 = vpop.eup %3737 }
 0xd97   : > { %v2638_v9 = vmul.f32 %v3738_v7, %v2637_v56 }
 0xd99   : > { %v2640_v10 = vadd.f32 %v2639_v8, %v2638_v9 }
 0xd9b   : > { %v2644_v11 = vpack.c.bf16 %v2640_v10, %v2640_v10 }
 0xd9d   : > { %3179 = vmatmul.mubr.msk.bf16.vlgmr.msra.gmra.mrb[32].mxu0 %vm1162_vm1, %v2644_v11  ;;  %3528 = vmatmul.mubr.msk.bf16.vlgmr.msra.gmra.mrb[72].mxu1 %vm1162_vm1, %v2644_v11 }
 0xd9e   : > { %2759 = vmatpush1.bf16.msra.mxu0 %v4860_v52  ;;  %3532 = vmatpush3.bf16.msra.mxu1 %v4875_v51 }
 0xd9f   : > { %2760 = vmatprep.subr.bf16.mxu0 %v4865_v58  ;;  %3533 = vmatprep.subr.bf16.mxu1 %v5169_v0 }
 0xda0   : > { %2790 = vmatprep.mubr.bf16.mxu0 %v5193_v4  ;;  %3535 = vmatprep.mubr.msk.bf16.mxu1 %vm3862_vm0, %v5169_v0 }
 0xda2   : > { %2761 = vmatpush1.bf16.msra.mxu0 %v4883_v6  ;;  %3534 = vmatpush3.bf16.msra.mxu1 %v4891_v31 }
 0xda3   : > { %3539 = vmatprep.subr.bf16.mxu0 %v5169_v0 }
 0xe70   : > { %v2682_v29 = vpop.f32.mrb[32].mxu0  ;;  %v2723_v12 = vpop.f32.mrb[72].mxu1 }
 0xe71   : > { %v3551_v52 = vadd.f32 %v2682_v29, %v4920_v44  ;;  %v2684_v51 = vpop.f32.mrb[33].mxu0  ;;  %v3529_v13 = vpop.f32.mrb[73].mxu1  ;;  %v2743_v23 = vadd.f32 %v4931_v19, %v2723_v12 }
 0xe72   : > { %v2686_v58 = vpop.f32.mrb[34].mxu0  ;;  %v2726_v14 = vpop.f32.mrb[74].mxu1  ;;  %v3552_v17 = vadd.f32 %v2684_v51, %v4924_v50 }
 0xe73   : > { %v3181_v15 = vmul.f32 -1.442695, %v3551_v52  ;;  %v2687_v16 = vpop.f32.mrb[35].mxu0  ;;  %v3530_v4 = vpop.f32.mrb[75].mxu1 }
 0xe74   : > { %v3182_v18 = vmul.f32 -1.442695, %v3552_v17 }
 0xe75   : > { %3739 = vpow2.f32 %v3181_v15 }
 0xe76   : > { %3741 = vpow2.f32 %v3182_v18 }
 0xe7f   : > { %v3740_v6 = vpop.eup %3739 }
 0xe80   : > { %v2733_v31 = vadd.f32 1.0, %v3740_v6  ;;  %v3742_v20 = vpop.eup %3741 }
 0xe81   : > { %v2740_v22 = vadd.f32 1.0, %v3742_v20 }
 0xe82   : > { %3743 = vrcp.f32 %v2733_v31 }
 0xe83   : > { %3745 = vrcp.f32 %v2740_v22 }
 0xe8c   : > { %v3744_v24 = vpop.eup %3743 }
 0xe8d   : > { %v2744_v61 = vmul.f32 %v3744_v24, %v2743_v23  ;;  %v3746_v26 = vpop.eup %3745 }
 0xe8e   : > { %v2747_v27 = vsub.f32 1.0, %v3746_v26  ;;  %v2749_v63 = vmul.f32 %v3746_v26, %v2640_v10 }
 0xe8f   : > { %v2745_v25 = vadd.f32 %v2744_v61, %v2050_v41 }
 0xe91   : > { %3747 = vtanh.f32 %v2745_v25 }
 0xe9b   : > { %v3748_v28 = vpop.eup %3747 }
 0xe9c   : > { %v2748_v62 = vmul.f32 %v3748_v28, %v2747_v27 }
 0xe9e   : > { %v2750_v39 = vadd.f32 %v2749_v63, %v2748_v62 }
 0xea0   : > { %v2754_v5 = vpack.c.bf16 %v2750_v39, %v2750_v39 }
 0xea2   : > { %3183 = vmatmul.mubr.msk.bf16.vlgmr.msra.gmra.mrb[44].mxu0 %vm1162_vm1, %v2754_v5  ;;  %3536 = vmatmul.mubr.msk.bf16.vlgmr.msra.gmra.mrb[76].mxu1 %vm1162_vm1, %v2754_v5 }
 0xea3   : > { %3543 = vmatprep.mubr.msk.bf16.mxu0 %vm3862_vm0, %v5169_v0  ;;  %3540 = vmatpush3.bf16.msra.mxu0 %v3717_v53 }
 0xea4   : > { %3541 = vmatprep.subr.bf16.mxu0 %v5169_v0 }
 0xea7   : > { %3542 = vmatpush3.bf16.msra.mxu0 %v3718_v40 }
 0xf75   : > { %v2792_v42 = vpop.f32.mrb[44].mxu0  ;;  %v2833_v55 = vpop.f32.mrb[76].mxu1 }
 0xf76   : > { %v3553_v46 = vadd.f32 %v2792_v42, %v4920_v44  ;;  %v2794_v43 = vpop.f32.mrb[45].mxu0  ;;  %v3537_v1 = vpop.f32.mrb[77].mxu1  ;;  %v2853_v44 = vadd.f32 %v4931_v19, %v2833_v55 }
 0xf77   : > { %v2796_v3 = vpop.f32.mrb[46].mxu0  ;;  %v2836_v59 = vpop.f32.mrb[78].mxu1  ;;  %v3554_v30 = vadd.f32 %v2794_v43, %v4924_v50 }
 0xf78   : > { %v3185_v60 = vmul.f32 -1.442695, %v3553_v46  ;;  %v2797_v48 = vpop.f32.mrb[47].mxu0  ;;  %v3538_v57 = vpop.f32.mrb[79].mxu1 }
 0xf79   : > { %v3186_v32 = vmul.f32 -1.442695, %v3554_v30 }
 0xf7a   : > { %3749 = vpow2.f32 %v3185_v60 }
 0xf7b   : > { %3751 = vpow2.f32 %v3186_v32 }
 0xf84   : > { %v3750_v34 = vpop.eup %3749 }
 0xf85   : > { %v2843_v0 = vadd.f32 1.0, %v3750_v34  ;;  %v3752_v47 = vpop.eup %3751 }
 0xf86   : > { %v2850_v35 = vadd.f32 1.0, %v3752_v47 }
 0xf87   : > { %3753 = vrcp.f32 %v2843_v0 }
 0xf88   : > { %3755 = vrcp.f32 %v2850_v35 }
 0xf91   : > { %v3754_v36 = vpop.eup %3753 }
 0xf92   : > { %v2854_v38 = vmul.f32 %v3754_v36, %v2853_v44  ;;  %v3756_v50 = vpop.eup %3755 }
 0xf93   : > { %v2857_v45 = vsub.f32 1.0, %v3756_v50  ;;  %v2859_v54 = vmul.f32 %v3756_v50, %v2750_v39 }
 0xf94   : > { %v2855_v2 = vadd.f32 %v2854_v38, %v2364_v37 }
 0xf96   : > { %3757 = vtanh.f32 %v2855_v2 }
 0xfa0   : > { %v3758_v49 = vpop.eup %3757 }
 0xfa1   : > { %v2858_v56 = vmul.f32 %v3758_v49, %v2857_v45 }
 0xfa3   : > { %v2860_v7 = vadd.f32 %v2859_v54, %v2858_v56 }
 0xfa5   : > { %v2862_v8 = vpack.c.bf16 %v2860_v7, %v2860_v7  ;;  %2861 = vst.msk [vmem:[%s559_s20] sm:$0xff] %vm1162_vm1, %v2860_v7 }
 0xfa7   : > { %3544 = vmatmul.mubr.msk.bf16.vlgmr.msra.gmra.mrb[48].mxu0 %vm1162_vm1, %v2862_v8 }
 0xfa8   : > { %3810 = shalt.err (!%p3807_p7)
}
 0xfa9   : > { %s3811_s22 = scalar_lea.hbm %s4998_s23, 128  ;;  %s3815_s0 = scalar_lea.hbm %s5059_s15, 256 }
 0xfaa   : > { %p3812_p10 = scmp.ne.s32.totalorder %s4998_s23, %s3811_s22  ;;  %p3816_p13 = scmp.lt.u32.totalorder %s4998_s23, %s5059_s15 }
 0xfab   : > { %p3817_p0 = scmp.lt.u32.totalorder %s3815_s0, %s3811_s22  ;;  %p3819_p2 = scmp.lt.u32.totalorder %s3811_s22, %s4998_s23 }
 0xfac   : > { %p3813_p11 = pnand %p3812_p10, %p3984_p6 }
 0xfad   : > { %p3818_p1 = por %p3817_p0, %p3816_p13 }
 0xfae   : > { %p3814_p12 = pneg %p3813_p11 }
 0xfaf   : > { %p3820_p3 = por %p3819_p2, %p3818_p1 }
 0xfb1   : > { %p3821_p4 = pnand %p3820_p3, %p3814_p12 }
 0xfb3   : > { %3824 = shalt.err (!%p3821_p4)
}
 0xfb4   : > { %3571 = dma.vmem_to_hbm [thread:$0]  (%p3984_p6), %s2953_s16, 128, %s4998_s23, %s2936_s30   ;;  %v3187_v33 = vld [vmem:[%s5056_s12] ss:$0 sm:$0xff]  ;;  %vm2929_vm3 = vcmask 64512  }
 0xfb5   : > { %s5230_s19 = sshll.u32 %s4853_s24, 3 }
 0xfb6   : > { %s567_s20 = scalar_lea.vmem %s5058_s14, %s5230_s19 }
0x107a   : > { %v2923_v19 = vpop.f32.mrb[48].mxu0 }
0x107b   : > { %v2924_v21 = vadd.f32 %v3187_v33, %v2923_v19  ;;  %v3545_v9 = vpop.f32.mrb[49].mxu0 }
0x107c   : > { %v2926_v10 = vpop.f32.mrb[50].mxu0 }
0x107d   : > { %2930 = vst.msk [vmem:[%s567_s20] sm:$0xff] %vm2929_vm3, %v2924_v21  ;;  %v3546_v11 = vpop.f32.mrb[51].mxu0 }
0x107e PF: > { %s2971_s16 = sand.u32 1, %s3847_s18   ;;  %p3574_p6 = pnand %p3055_p9, %p3988_p8 }
0x107f   : > { %s2972_s24 = scalar_lea.sflag [#allocation5], %s2971_s16 }
0x1080   : > { %3842 = dma.done.wait (!%p3574_p6), %s2972_s24, 128  }
0x1081   : > { %3844 = vsyncadd (!%p3574_p6), %s2972_s24, 4294967168  ;;  %s5232_s21 = sld [smem:[#allocation10_spill]]  ;;  %s5233_s18 = sld [smem:[#allocation7_spill]] }
0x1082   : > { %s5234_s19 = sld [smem:[#allocation8_spill]]  ;;  %s5235_s20 = sld [smem:[#allocation11_spill]] }
0x1087   : > { %p26_p5 = scmp.ge.s32.totalorder %s5232_s21, 4  }
0x1089   :  { %28 = sbr.rel (!%p26_p5) target bundleno = 6 (0x6), region = 175 }
0x1090   :  { %2977 = vsyncpa [#allocation5], 1 }
0x1091   :  { %2979 = vsyncpa [#allocation5 + $0x1], 1 }

</bundles_post_ra>
